<compile_context>
chip_gen: v6e
topology: v6e:2x2x1
jax: 0.10.0
libtpu: 0.0.40
codegen_flags: <defaults>
</compile_context>

<pallas_src>
import functools

import jax
import jax.numpy as jnp
import numpy as np
from jax.experimental import pallas as pl
from jax.experimental.pallas import tpu as pltpu

MAX_LENGTH = 10
LANES = 128   # TPU lane width; everything is padded to 128 lanes / 8-row multiples


# ----------------------------------------------------------------------------
# Kernel: one grid step == one decoder time step.  Weights stay resident in VMEM
# across the whole grid; the hidden state lives in a persistent VMEM scratch.
# ----------------------------------------------------------------------------
def attn_decoder_kernel(tok_ref,        # SMEM (T,) int32   -- scalar prefetch
                        emb_ref,        # VMEM (128,128)    -- embedding table (zero padded)
                        enc_ref,        # VMEM (128,128)    -- encoder outputs (zero padded)
                        w_ref,          # VMEM (11,128,128) -- packed, pre-split weights
                        b_ref,          # VMEM (16,128)     -- packed, pre-split biases
                        h0_ref,         # VMEM (8,128)      -- initial hidden (row 0)
                        out_ref,        # VMEM (8,128)      -- per-step output slab
                        h_scratch,      # VMEM (1,128)      -- persistent hidden state
                        *, H, V, L):
    t = pl.program_id(0)

    @pl.when(t == 0)
    def _():
        h_scratch[...] = h0_ref[0:1, :]

    lane = jax.lax.broadcasted_iota(jnp.int32, (1, LANES), 1)

    # ---- embedding lookup as a one-hot matmul (fully lane-aligned, no gather) ----
    tok = tok_ref[t]
    onehot = (lane == tok).astype(jnp.float32)                                   # (1,128)
    x = jnp.dot(onehot, emb_ref[...], preferred_element_type=jnp.float32)        # (1,128)
    # TODO(synk): train-mode dropout on the embedding is not implemented (eval semantics).

    h = h_scratch[...]                                                           # (1,128)

    # ---- attn_weights = softmax(attn(cat(x, h)))  with pre-split weights ----
    attn_logits = (jnp.dot(x, w_ref[0], preferred_element_type=jnp.float32)
                   + jnp.dot(h, w_ref[1], preferred_element_type=jnp.float32)
                   + b_ref[0:1, :])                                              # (1,128)
    attn_logits = jnp.where(lane < L, attn_logits, -1e30)
    m = jnp.max(attn_logits, axis=1, keepdims=True)
    e = jnp.exp(attn_logits - m)
    s = jnp.sum(e, axis=1, keepdims=True)
    inv = pl.reciprocal(s, approx=True)
    inv = inv * (2.0 - s * inv)            # one Newton step -> near-exact 1/s
    attn_w = e * inv                                                             # (1,128)

    # ---- attn_applied = attn_weights @ encoder_outputs ----
    attn_applied = jnp.dot(attn_w, enc_ref[...], preferred_element_type=jnp.float32)

    # ---- gru_in = relu(attn_combine(cat(x, attn_applied))) ----
    comb = (jnp.dot(x, w_ref[2], preferred_element_type=jnp.float32)
            + jnp.dot(attn_applied, w_ref[3], preferred_element_type=jnp.float32)
            + b_ref[1:2, :])
    gru_in = jnp.maximum(comb, 0.0)

    # ---- single GRU step, per-gate pre-split weights (PyTorch order r, z, n) ----
    gi_r = jnp.dot(gru_in, w_ref[4], preferred_element_type=jnp.float32) + b_ref[2:3, :]
    gi_z = jnp.dot(gru_in, w_ref[5], preferred_element_type=jnp.float32) + b_ref[3:4, :]
    gi_n = jnp.dot(gru_in, w_ref[6], preferred_element_type=jnp.float32) + b_ref[4:5, :]
    gh_r = jnp.dot(h, w_ref[7], preferred_element_type=jnp.float32) + b_ref[5:6, :]
    gh_z = jnp.dot(h, w_ref[8], preferred_element_type=jnp.float32) + b_ref[6:7, :]
    gh_n = jnp.dot(h, w_ref[9], preferred_element_type=jnp.float32) + b_ref[7:8, :]
    r = jax.nn.sigmoid(gi_r + gh_r)
    z = jax.nn.sigmoid(gi_z + gh_z)
    n = jnp.tanh(gi_n + r * gh_n)
    h_new = (1.0 - z) * n + z * h                                                # (1,128)
    h_scratch[...] = h_new

    # ---- logp = log_softmax(out(h_new)) ----
    logits = jnp.dot(h_new, w_ref[10], preferred_element_type=jnp.float32) + b_ref[8:9, :]
    logits = jnp.where(lane < V, logits, -1e30)
    lm = jnp.max(logits, axis=1, keepdims=True)
    lse = jnp.log(jnp.sum(jnp.exp(logits - lm), axis=1, keepdims=True)) + lm
    logp = logits - lse                                                          # (1,128)

    # single lane-dense (8,128) slab: row0=logp, row1=h_new, row2=attn_w
    out_ref[...] = jnp.concatenate(
        [logp, h_new, attn_w, jnp.zeros((5, LANES), jnp.float32)], axis=0)


# ----------------------------------------------------------------------------
# Wrapper: fused multi-step decode (teacher forced) — one pallas_call for T steps.
# ----------------------------------------------------------------------------
def attn_decoder_decode(tokens, hidden, encoder_outputs, params):
    H = params["hidden_size"]
    V = params["output_size"]
    L = params["max_length"]
    T = int(tokens.shape[0])

    tokens = tokens.astype(jnp.int32)
    enc_pad = jnp.pad(encoder_outputs.astype(jnp.float32),
                      ((0, LANES - L), (0, LANES - H)))                 # (128,128)
    h0_pad = jnp.pad(hidden.reshape(1, H).astype(jnp.float32),
                     ((0, 7), (0, LANES - H)))                          # (8,128)

    kernel = functools.partial(attn_decoder_kernel, H=H, V=V, L=L)

    grid_spec = pltpu.PrefetchScalarGridSpec(
        num_scalar_prefetch=1,
        grid=(T,),
        in_specs=[
            pl.BlockSpec((LANES, LANES), lambda t, toks: (0, 0)),        # embedding table
            pl.BlockSpec((LANES, LANES), lambda t, toks: (0, 0)),        # encoder outputs
            pl.BlockSpec((11, LANES, LANES), lambda t, toks: (0, 0, 0)), # weight slab
            pl.BlockSpec((16, LANES), lambda t, toks: (0, 0)),           # bias slab
            pl.BlockSpec((8, LANES), lambda t, toks: (0, 0)),            # initial hidden
        ],
        out_specs=pl.BlockSpec((None, 8, LANES), lambda t, toks: (t, 0, 0)),
        scratch_shapes=[pltpu.VMEM((1, LANES), jnp.float32)],
    )

    out = pl.pallas_call(
        kernel,
        out_shape=jax.ShapeDtypeStruct((T, 8, LANES), jnp.float32),
        grid_spec=grid_spec,
        compiler_params=pltpu.CompilerParams(dimension_semantics=("arbitrary",)),
    )(tokens, params["emb_pad"], enc_pad, params["w_slab"], params["b_slab"], h0_pad)

    logp = out[:, 0, :V]      # (T, V)
    h_seq = out[:, 1, :H]     # (T, H) hidden after each step
    attn_w = out[:, 2, :L]    # (T, L)
    return logp, h_seq, attn_w


def attn_decoder_forward(token, hidden, encoder_outputs, params):
    """Single decoder step — exact analogue of AttnDecoderRNN.forward."""
    H = params["hidden_size"]
    tokens = jnp.asarray(token, jnp.int32).reshape(1)
    logp, h_seq, attn_w = attn_decoder_decode(tokens, hidden.reshape(1, H),
                                              encoder_outputs, params)
    return logp[0:1], h_seq[0].reshape(1, 1, H), attn_w[0:1]


# ----------------------------------------------------------------------------
# Pure-JAX reference (identical math) for correctness checks.
# ----------------------------------------------------------------------------
def reference_forward(token, hidden, encoder_outputs, params):
    H = params["hidden_size"]
    x = params["embedding"][token].reshape(1, H)
    h = hidden.reshape(1, H)
    attn_logits = jnp.concatenate([x, h], 1) @ params["w_attn"] + params["b_attn"]
    attn_w = jax.nn.softmax(attn_logits, axis=1)
    attn_applied = attn_w @ encoder_outputs
    comb = jnp.concatenate([x, attn_applied], 1) @ params["w_comb"] + params["b_comb"]
    gru_in = jax.nn.relu(comb)
    gi = gru_in @ params["w_ih"] + params["b_ih"]
    gh = h @ params["w_hh"] + params["b_hh"]
    r = jax.nn.sigmoid(gi[:, 0:H] + gh[:, 0:H])
    z = jax.nn.sigmoid(gi[:, H:2 * H] + gh[:, H:2 * H])
    n = jnp.tanh(gi[:, 2 * H:3 * H] + r * gh[:, 2 * H:3 * H])
    h_new = (1.0 - z) * n + z * h
    logits = h_new @ params["w_out"] + params["b_out"]
    logp = jax.nn.log_softmax(logits, axis=1)
    return logp, h_new.reshape(1, 1, H), attn_w


# ----------------------------------------------------------------------------
# Parameter init + one-time packing into lane-dense, pre-split VMEM slabs.
# ----------------------------------------------------------------------------
def _pad_block(a):
    r, c = a.shape
    return jnp.pad(a.astype(jnp.float32), ((0, LANES - r), (0, LANES - c)))


def _pad_row(b):
    b = b.reshape(1, -1).astype(jnp.float32)
    return jnp.pad(b, ((0, 0), (0, LANES - b.shape[1])))


def pack_params(p):
    H = p["hidden_size"]
    blocks = [
        p["w_attn"][:H], p["w_attn"][H:],          # 0: attn(x), 1: attn(h)
        p["w_comb"][:H], p["w_comb"][H:],          # 2: comb(x), 3: comb(attn_applied)
        p["w_ih"][:, 0:H], p["w_ih"][:, H:2 * H], p["w_ih"][:, 2 * H:3 * H],  # 4,5,6: ih r,z,n
        p["w_hh"][:, 0:H], p["w_hh"][:, H:2 * H], p["w_hh"][:, 2 * H:3 * H],  # 7,8,9: hh r,z,n
        p["w_out"],                                # 10: output projection
    ]
    w_slab = jnp.stack([_pad_block(b) for b in blocks], axis=0)       # (11,128,128)

    rows = [
        p["b_attn"], p["b_comb"],
        p["b_ih"][:, 0:H], p["b_ih"][:, H:2 * H], p["b_ih"][:, 2 * H:3 * H],
        p["b_hh"][:, 0:H], p["b_hh"][:, H:2 * H], p["b_hh"][:, 2 * H:3 * H],
        p["b_out"],
    ]
    b_slab = jnp.concatenate(
        [_pad_row(r) for r in rows]
        + [jnp.zeros((16 - len(rows), LANES), jnp.float32)], axis=0)  # (16,128)

    emb_pad = _pad_block(p["embedding"])                              # (128,128)
    return {"w_slab": w_slab, "b_slab": b_slab, "emb_pad": emb_pad}


def init_params(key, hidden_size, output_size, max_length):
    H, V, L = hidden_size, output_size, max_length
    ks = jax.random.split(key, 12)

    def unif(k, shape, fan_in):
        b = 1.0 / np.sqrt(fan_in)
        return jax.random.uniform(k, shape, jnp.float32, -b, b)

    p = {
        "hidden_size": H, "output_size": V, "max_length": L,
        "embedding": jax.random.normal(ks[0], (V, H), jnp.float32),
        # nn.Linear(2H, L): weight stored transposed as (2H, L)
        "w_attn": unif(ks[1], (2 * H, L), 2 * H),
        "b_attn": unif(ks[2], (1, L), 2 * H),
        # nn.Linear(2H, H)
        "w_comb": unif(ks[3], (2 * H, H), 2 * H),
        "b_comb": unif(ks[4], (1, H), 2 * H),
        # nn.GRU(H, H): weight_ih_l0 / weight_hh_l0 stored transposed (H, 3H)
        "w_ih": unif(ks[5], (H, 3 * H), H),
        "w_hh": unif(ks[6], (H, 3 * H), H),
        "b_ih": unif(ks[7], (1, 3 * H), H),
        "b_hh": unif(ks[8], (1, 3 * H), H),
        # nn.Linear(H, V)
        "w_out": unif(ks[9], (H, V), H),
        "b_out": unif(ks[10], (1, V), H),
    }
    p.update(pack_params(p))
    return p


if __name__ == "__main__":
    H, V, L = 32, 20, MAX_LENGTH
    key = jax.random.PRNGKey(0)
    kp, ke, kt = jax.random.split(key, 3)

    params = init_params(kp, H, V, L)
    token = jnp.array(3, dtype=jnp.int32)
    hidden = jnp.zeros((1, 1, H), jnp.float32)             # initHidden()
    encoder_outputs = jax.random.normal(ke, (L, H), jnp.float32)

    # ---- single step (matches AttnDecoderRNN.forward) ----
    logp, h_new, attn_w = attn_decoder_forward(token, hidden, encoder_outputs, params)
    jax.block_until_ready((logp, h_new, attn_w))

    r_logp, r_h, r_attn = reference_forward(token, hidden, encoder_outputs, params)
    assert logp.shape == (1, V) and h_new.shape == (1, 1, H) and attn_w.shape == (1, L)
    np.testing.assert_allclose(np.asarray(logp), np.asarray(r_logp), rtol=1e-3, atol=1e-3)
    np.testing.assert_allclose(np.asarray(h_new), np.asarray(r_h), rtol=1e-3, atol=1e-3)
    np.testing.assert_allclose(np.asarray(attn_w), np.asarray(r_attn), rtol=1e-3, atol=1e-3)

    # ---- fused multi-step (teacher-forced) decode: one pallas_call for all steps ----
    T = 6
    tokens = jax.random.randint(kt, (T,), 0, V, dtype=jnp.int32)
    logp_seq, h_seq, attn_seq = attn_decoder_decode(
        tokens, hidden.reshape(1, H), encoder_outputs, params)
    jax.block_until_ready((logp_seq, h_seq, attn_seq))

    h_ref = hidden
    for t in range(T):
        lp_t, h_ref, aw_t = reference_forward(tokens[t], h_ref, encoder_outputs, params)
        np.testing.assert_allclose(np.asarray(logp_seq[t]), np.asarray(lp_t[0]),
                                   rtol=1e-3, atol=1e-3)
        np.testing.assert_allclose(np.asarray(attn_seq[t]), np.asarray(aw_t[0]),
                                   rtol=1e-3, atol=1e-3)
        np.testing.assert_allclose(np.asarray(h_seq[t]), np.asarray(h_ref[0, 0]),
                                   rtol=1e-3, atol=1e-3)

    print("KERNEL_OK")
</pallas_src>

<mosaic_0001>
module attributes {stable_mosaic.version = 11 : i64} {
  func.func @attn_decoder_kernel(%arg0: i32, %arg1: memref<1xi32, #tpu.memory_space<smem>>, %arg2: memref<128x128xf32, #tpu.memory_space<vmem>>, %arg3: memref<128x128xf32, #tpu.memory_space<vmem>>, %arg4: memref<11x128x128xf32, #tpu.memory_space<vmem>>, %arg5: memref<16x128xf32, #tpu.memory_space<vmem>>, %arg6: memref<8x128xf32, #tpu.memory_space<vmem>>, %arg7: memref<1x8x128xf32, #tpu.memory_space<vmem>>, %arg8: memref<1x128xf32, #tpu.memory_space<vmem>>) attributes {dimension_semantics = [#tpu.dimension_semantics<arbitrary>], iteration_bounds = array<i64: 1>, scalar_prefetch = 1 : i64, scratch_operands = 1 : i64, tpu.core_type = #tpu.core_type<tc>, window_params = [{pipeline_mode = #tpu.pipeline_mode<synchronous>, transform_indices = @transform_0, window_bounds = array<i64: 128, 128>}, {pipeline_mode = #tpu.pipeline_mode<synchronous>, transform_indices = @transform_1, window_bounds = array<i64: 128, 128>}, {pipeline_mode = #tpu.pipeline_mode<synchronous>, transform_indices = @transform_2, window_bounds = array<i64: 11, 128, 128>}, {pipeline_mode = #tpu.pipeline_mode<synchronous>, transform_indices = @transform_3, window_bounds = array<i64: 16, 128>}, {pipeline_mode = #tpu.pipeline_mode<synchronous>, transform_indices = @transform_4, window_bounds = array<i64: 8, 128>}, {transform_indices = @transform_5, window_bounds = array<i64: 1, 8, 128>}]} {
    %c0_i32 = arith.constant 0 : i32
    %0 = arith.cmpi eq, %arg0, %c0_i32 : i32
    %1 = arith.extui %0 : i1 to i32
    %c0_i32_0 = arith.constant 0 : i32
    %2 = arith.cmpi ne, %1, %c0_i32_0 : i32
    scf.if %2 {
      %c0_76 = arith.constant 0 : index
      %c0_77 = arith.constant 0 : index
      %129 = vector.load %arg6[%c0_76, %c0_77] : memref<8x128xf32, #tpu.memory_space<vmem>>, vector<1x128xf32>
      %c0_78 = arith.constant 0 : index
      %c0_79 = arith.constant 0 : index
      %130 = vector.load %arg8[%c0_78, %c0_79] : memref<1x128xf32, #tpu.memory_space<vmem>>, vector<1x128xf32>
      tpu.vector_store %arg8[%c0_78, %c0_79], %129 {strides = array<i32>} : memref<1x128xf32, #tpu.memory_space<vmem>>, vector<1x128xf32>,
    } else {
    }
    %3 = tpu.iota {dimensions = array<i32: 1>} : vector<1x128xi32>
    %4 = arith.index_cast %arg0 : i32 to index
    %5 = memref.load %arg1[%4] : memref<1xi32, #tpu.memory_space<smem>>
    %6 = vector.broadcast %5 : i32 to vector<1x128xi32>
    %7 = arith.cmpi eq, %3, %6 : vector<1x128xi32>
    %8 = arith.extui %7 : vector<1x128xi1> to vector<1x128xi32>
    %9 = arith.sitofp %8 : vector<1x128xi32> to vector<1x128xf32>
    %c0 = arith.constant 0 : index
    %c0_1 = arith.constant 0 : index
    %10 = vector.load %arg2[%c0, %c0_1] : memref<128x128xf32, #tpu.memory_space<vmem>>, vector<128x128xf32>
    %cst = arith.constant dense<0.000000e+00> : vector<1x128xf32>
    %11 = tpu.matmul %9, %10, %cst {dimension_numbers = #tpu.dot_dimension_numbers<[1], [0], [0], [1], [0, 0, 1, 1], [], []>} : vector<1x128xf32>, vector<128x128xf32>, vector<1x128xf32> -> vector<1x128xf32>
    %c0_2 = arith.constant 0 : index
    %c0_3 = arith.constant 0 : index
    %12 = vector.load %arg8[%c0_2, %c0_3] : memref<1x128xf32, #tpu.memory_space<vmem>>, vector<1x128xf32>
    %c0_4 = arith.constant 0 : index
    %c0_5 = arith.constant 0 : index
    %c0_6 = arith.constant 0 : index
    %13 = vector.load %arg4[%c0_4, %c0_5, %c0_6] : memref<11x128x128xf32, #tpu.memory_space<vmem>>, vector<1x128x128xf32>
    %14 = vector.shape_cast %13 : vector<1x128x128xf32> to vector<128x128xf32>
    %cst_7 = arith.constant dense<0.000000e+00> : vector<1x128xf32>
    %15 = tpu.matmul %11, %14, %cst_7 {dimension_numbers = #tpu.dot_dimension_numbers<[1], [0], [0], [1], [0, 0, 1, 1], [], []>} : vector<1x128xf32>, vector<128x128xf32>, vector<1x128xf32> -> vector<1x128xf32>
    %c1 = arith.constant 1 : index
    %c0_8 = arith.constant 0 : index
    %c0_9 = arith.constant 0 : index
    %16 = vector.load %arg4[%c1, %c0_8, %c0_9] : memref<11x128x128xf32, #tpu.memory_space<vmem>>, vector<1x128x128xf32>
    %17 = vector.shape_cast %16 : vector<1x128x128xf32> to vector<128x128xf32>
    %cst_10 = arith.constant dense<0.000000e+00> : vector<1x128xf32>
    %18 = tpu.matmul %12, %17, %cst_10 {dimension_numbers = #tpu.dot_dimension_numbers<[1], [0], [0], [1], [0, 0, 1, 1], [], []>} : vector<1x128xf32>, vector<128x128xf32>, vector<1x128xf32> -> vector<1x128xf32>
    %19 = arith.addf %15, %18 : vector<1x128xf32>
    %c0_11 = arith.constant 0 : index
    %c0_12 = arith.constant 0 : index
    %20 = vector.load %arg5[%c0_11, %c0_12] : memref<16x128xf32, #tpu.memory_space<vmem>>, vector<1x128xf32>
    %21 = arith.addf %19, %20 : vector<1x128xf32>
    %c10_i32 = arith.constant 10 : i32
    %22 = vector.broadcast %c10_i32 : i32 to vector<1x128xi32>
    %23 = arith.cmpi slt, %3, %22 : vector<1x128xi32>
    %cst_13 = arith.constant -1.000000e+30 : f32
    %24 = vector.broadcast %cst_13 : f32 to vector<1x128xf32>
    %25 = arith.select %23, %21, %24 : vector<1x128xi1>, vector<1x128xf32>
    %cst_14 = arith.constant dense<0xFF800000> : vector<1xf32>
    %26 = vector.multi_reduction <maximumf>, %25, %cst_14 [1] : vector<1x128xf32> to vector<1xf32>
    %27 = vector.shape_cast %26 : vector<1xf32> to vector<1x1xf32>
    %28 = vector.broadcast %27 : vector<1x1xf32> to vector<1x128xf32>
    %29 = arith.subf %25, %28 : vector<1x128xf32>
    %30 = math.exp %29 : vector<1x128xf32>
    %cst_15 = arith.constant dense<0.000000e+00> : vector<1xf32>
    %31 = vector.multi_reduction <add>, %30, %cst_15 [1] : vector<1x128xf32> to vector<1xf32>
    %32 = vector.shape_cast %31 : vector<1xf32> to vector<1x1xf32>
    %33 = tpu.reciprocal %32 {approx = true} : vector<1x1xf32> -> vector<1x1xf32>
    %34 = arith.mulf %32, %33 : vector<1x1xf32>
    %cst_16 = arith.constant 2.000000e+00 : f32
    %35 = vector.broadcast %cst_16 : f32 to vector<1x1xf32>
    %36 = arith.subf %35, %34 : vector<1x1xf32>
    %37 = arith.mulf %33, %36 : vector<1x1xf32>
    %38 = vector.broadcast %37 : vector<1x1xf32> to vector<1x128xf32>
    %39 = arith.mulf %30, %38 : vector<1x128xf32>
    %c0_17 = arith.constant 0 : index
    %c0_18 = arith.constant 0 : index
    %40 = vector.load %arg3[%c0_17, %c0_18] : memref<128x128xf32, #tpu.memory_space<vmem>>, vector<128x128xf32>
    %cst_19 = arith.constant dense<0.000000e+00> : vector<1x128xf32>
    %41 = tpu.matmul %39, %40, %cst_19 {dimension_numbers = #tpu.dot_dimension_numbers<[1], [0], [0], [1], [0, 0, 1, 1], [], []>} : vector<1x128xf32>, vector<128x128xf32>, vector<1x128xf32> -> vector<1x128xf32>
    %c2 = arith.constant 2 : index
    %c0_20 = arith.constant 0 : index
    %c0_21 = arith.constant 0 : index
    %42 = vector.load %arg4[%c2, %c0_20, %c0_21] : memref<11x128x128xf32, #tpu.memory_space<vmem>>, vector<1x128x128xf32>
    %43 = vector.shape_cast %42 : vector<1x128x128xf32> to vector<128x128xf32>
    %cst_22 = arith.constant dense<0.000000e+00> : vector<1x128xf32>
    %44 = tpu.matmul %11, %43, %cst_22 {dimension_numbers = #tpu.dot_dimension_numbers<[1], [0], [0], [1], [0, 0, 1, 1], [], []>} : vector<1x128xf32>, vector<128x128xf32>, vector<1x128xf32> -> vector<1x128xf32>
    %c3 = arith.constant 3 : index
    %c0_23 = arith.constant 0 : index
    %c0_24 = arith.constant 0 : index
    %45 = vector.load %arg4[%c3, %c0_23, %c0_24] : memref<11x128x128xf32, #tpu.memory_space<vmem>>, vector<1x128x128xf32>
    %46 = vector.shape_cast %45 : vector<1x128x128xf32> to vector<128x128xf32>
    %cst_25 = arith.constant dense<0.000000e+00> : vector<1x128xf32>
    %47 = tpu.matmul %41, %46, %cst_25 {dimension_numbers = #tpu.dot_dimension_numbers<[1], [0], [0], [1], [0, 0, 1, 1], [], []>} : vector<1x128xf32>, vector<128x128xf32>, vector<1x128xf32> -> vector<1x128xf32>
    %48 = arith.addf %44, %47 : vector<1x128xf32>
    %c1_26 = arith.constant 1 : index
    %c0_27 = arith.constant 0 : index
    %49 = vector.load %arg5[%c1_26, %c0_27] : memref<16x128xf32, #tpu.memory_space<vmem>>, vector<1x128xf32>
    %50 = arith.addf %48, %49 : vector<1x128xf32>
    %cst_28 = arith.constant 0.000000e+00 : f32
    %51 = vector.broadcast %cst_28 : f32 to vector<1x128xf32>
    %52 = arith.maximumf %50, %51 : vector<1x128xf32>
    %c4 = arith.constant 4 : index
    %c0_29 = arith.constant 0 : index
    %c0_30 = arith.constant 0 : index
    %53 = vector.load %arg4[%c4, %c0_29, %c0_30] : memref<11x128x128xf32, #tpu.memory_space<vmem>>, vector<1x128x128xf32>
    %54 = vector.shape_cast %53 : vector<1x128x128xf32> to vector<128x128xf32>
    %cst_31 = arith.constant dense<0.000000e+00> : vector<1x128xf32>
    %55 = tpu.matmul %52, %54, %cst_31 {dimension_numbers = #tpu.dot_dimension_numbers<[1], [0], [0], [1], [0, 0, 1, 1], [], []>} : vector<1x128xf32>, vector<128x128xf32>, vector<1x128xf32> -> vector<1x128xf32>
    %c2_32 = arith.constant 2 : index
    %c0_33 = arith.constant 0 : index
    %56 = vector.load %arg5[%c2_32, %c0_33] : memref<16x128xf32, #tpu.memory_space<vmem>>, vector<1x128xf32>
    %57 = arith.addf %55, %56 : vector<1x128xf32>
    %c5 = arith.constant 5 : index
    %c0_34 = arith.constant 0 : index
    %c0_35 = arith.constant 0 : index
    %58 = vector.load %arg4[%c5, %c0_34, %c0_35] : memref<11x128x128xf32, #tpu.memory_space<vmem>>, vector<1x128x128xf32>
    %59 = vector.shape_cast %58 : vector<1x128x128xf32> to vector<128x128xf32>
    %cst_36 = arith.constant dense<0.000000e+00> : vector<1x128xf32>
    %60 = tpu.matmul %52, %59, %cst_36 {dimension_numbers = #tpu.dot_dimension_numbers<[1], [0], [0], [1], [0, 0, 1, 1], [], []>} : vector<1x128xf32>, vector<128x128xf32>, vector<1x128xf32> -> vector<1x128xf32>
    %c3_37 = arith.constant 3 : index
    %c0_38 = arith.constant 0 : index
    %61 = vector.load %arg5[%c3_37, %c0_38] : memref<16x128xf32, #tpu.memory_space<vmem>>, vector<1x128xf32>
    %62 = arith.addf %60, %61 : vector<1x128xf32>
    %c6 = arith.constant 6 : index
    %c0_39 = arith.constant 0 : index
    %c0_40 = arith.constant 0 : index
    %63 = vector.load %arg4[%c6, %c0_39, %c0_40] : memref<11x128x128xf32, #tpu.memory_space<vmem>>, vector<1x128x128xf32>
    %64 = vector.shape_cast %63 : vector<1x128x128xf32> to vector<128x128xf32>
    %cst_41 = arith.constant dense<0.000000e+00> : vector<1x128xf32>
    %65 = tpu.matmul %52, %64, %cst_41 {dimension_numbers = #tpu.dot_dimension_numbers<[1], [0], [0], [1], [0, 0, 1, 1], [], []>} : vector<1x128xf32>, vector<128x128xf32>, vector<1x128xf32> -> vector<1x128xf32>
    %c4_42 = arith.constant 4 : index
    %c0_43 = arith.constant 0 : index
    %66 = vector.load %arg5[%c4_42, %c0_43] : memref<16x128xf32, #tpu.memory_space<vmem>>, vector<1x128xf32>
    %67 = arith.addf %65, %66 : vector<1x128xf32>
    %c7 = arith.constant 7 : index
    %c0_44 = arith.constant 0 : index
    %c0_45 = arith.constant 0 : index
    %68 = vector.load %arg4[%c7, %c0_44, %c0_45] : memref<11x128x128xf32, #tpu.memory_space<vmem>>, vector<1x128x128xf32>
    %69 = vector.shape_cast %68 : vector<1x128x128xf32> to vector<128x128xf32>
    %cst_46 = arith.constant dense<0.000000e+00> : vector<1x128xf32>
    %70 = tpu.matmul %12, %69, %cst_46 {dimension_numbers = #tpu.dot_dimension_numbers<[1], [0], [0], [1], [0, 0, 1, 1], [], []>} : vector<1x128xf32>, vector<128x128xf32>, vector<1x128xf32> -> vector<1x128xf32>
    %c5_47 = arith.constant 5 : index
    %c0_48 = arith.constant 0 : index
    %71 = vector.load %arg5[%c5_47, %c0_48] : memref<16x128xf32, #tpu.memory_space<vmem>>, vector<1x128xf32>
    %72 = arith.addf %70, %71 : vector<1x128xf32>
    %c8 = arith.constant 8 : index
    %c0_49 = arith.constant 0 : index
    %c0_50 = arith.constant 0 : index
    %73 = vector.load %arg4[%c8, %c0_49, %c0_50] : memref<11x128x128xf32, #tpu.memory_space<vmem>>, vector<1x128x128xf32>
    %74 = vector.shape_cast %73 : vector<1x128x128xf32> to vector<128x128xf32>
    %cst_51 = arith.constant dense<0.000000e+00> : vector<1x128xf32>
    %75 = tpu.matmul %12, %74, %cst_51 {dimension_numbers = #tpu.dot_dimension_numbers<[1], [0], [0], [1], [0, 0, 1, 1], [], []>} : vector<1x128xf32>, vector<128x128xf32>, vector<1x128xf32> -> vector<1x128xf32>
    %c6_52 = arith.constant 6 : index
    %c0_53 = arith.constant 0 : index
    %76 = vector.load %arg5[%c6_52, %c0_53] : memref<16x128xf32, #tpu.memory_space<vmem>>, vector<1x128xf32>
    %77 = arith.addf %75, %76 : vector<1x128xf32>
    %c9 = arith.constant 9 : index
    %c0_54 = arith.constant 0 : index
    %c0_55 = arith.constant 0 : index
    %78 = vector.load %arg4[%c9, %c0_54, %c0_55] : memref<11x128x128xf32, #tpu.memory_space<vmem>>, vector<1x128x128xf32>
    %79 = vector.shape_cast %78 : vector<1x128x128xf32> to vector<128x128xf32>
    %cst_56 = arith.constant dense<0.000000e+00> : vector<1x128xf32>
    %80 = tpu.matmul %12, %79, %cst_56 {dimension_numbers = #tpu.dot_dimension_numbers<[1], [0], [0], [1], [0, 0, 1, 1], [], []>} : vector<1x128xf32>, vector<128x128xf32>, vector<1x128xf32> -> vector<1x128xf32>
    %c7_57 = arith.constant 7 : index
    %c0_58 = arith.constant 0 : index
    %81 = vector.load %arg5[%c7_57, %c0_58] : memref<16x128xf32, #tpu.memory_space<vmem>>, vector<1x128xf32>
    %82 = arith.addf %80, %81 : vector<1x128xf32>
    %83 = arith.addf %57, %72 : vector<1x128xf32>
    %84 = arith.negf %83 : vector<1x128xf32>
    %85 = math.exp %84 : vector<1x128xf32>
    %cst_59 = arith.constant 1.000000e+00 : f32
    %86 = vector.broadcast %cst_59 : f32 to vector<1x128xf32>
    %87 = arith.addf %86, %85 : vector<1x128xf32>
    %88 = arith.divf %86, %87 : vector<1x128xf32>
    %89 = arith.addf %62, %77 : vector<1x128xf32>
    %90 = arith.negf %89 : vector<1x128xf32>
    %91 = math.exp %90 : vector<1x128xf32>
    %cst_60 = arith.constant 1.000000e+00 : f32
    %92 = vector.broadcast %cst_60 : f32 to vector<1x128xf32>
    %93 = arith.addf %92, %91 : vector<1x128xf32>
    %94 = arith.divf %92, %93 : vector<1x128xf32>
    %95 = arith.mulf %88, %82 : vector<1x128xf32>
    %96 = arith.addf %67, %95 : vector<1x128xf32>
    %97 = math.tanh %96 : vector<1x128xf32>
    %cst_61 = arith.constant 1.000000e+00 : f32
    %98 = vector.broadcast %cst_61 : f32 to vector<1x128xf32>
    %99 = arith.subf %98, %94 : vector<1x128xf32>
    %100 = arith.mulf %99, %97 : vector<1x128xf32>
    %101 = arith.mulf %94, %12 : vector<1x128xf32>
    %102 = arith.addf %100, %101 : vector<1x128xf32>
    %c0_62 = arith.constant 0 : index
    %c0_63 = arith.constant 0 : index
    %103 = vector.load %arg8[%c0_62, %c0_63] : memref<1x128xf32, #tpu.memory_space<vmem>>, vector<1x128xf32>
    tpu.vector_store %arg8[%c0_62, %c0_63], %102 {strides = array<i32>} : memref<1x128xf32, #tpu.memory_space<vmem>>, vector<1x128xf32>,
    %c10 = arith.constant 10 : index
    %c0_64 = arith.constant 0 : index
    %c0_65 = arith.constant 0 : index
    %104 = vector.load %arg4[%c10, %c0_64, %c0_65] : memref<11x128x128xf32, #tpu.memory_space<vmem>>, vector<1x128x128xf32>
    %105 = vector.shape_cast %104 : vector<1x128x128xf32> to vector<128x128xf32>
    %cst_66 = arith.constant dense<0.000000e+00> : vector<1x128xf32>
    %106 = tpu.matmul %102, %105, %cst_66 {dimension_numbers = #tpu.dot_dimension_numbers<[1], [0], [0], [1], [0, 0, 1, 1], [], []>} : vector<1x128xf32>, vector<128x128xf32>, vector<1x128xf32> -> vector<1x128xf32>
    %c8_67 = arith.constant 8 : index
    %c0_68 = arith.constant 0 : index
    %107 = vector.load %arg5[%c8_67, %c0_68] : memref<16x128xf32, #tpu.memory_space<vmem>>, vector<1x128xf32>
    %108 = arith.addf %106, %107 : vector<1x128xf32>
    %c20_i32 = arith.constant 20 : i32
    %109 = vector.broadcast %c20_i32 : i32 to vector<1x128xi32>
    %110 = arith.cmpi slt, %3, %109 : vector<1x128xi32>
    %cst_69 = arith.constant -1.000000e+30 : f32
    %111 = vector.broadcast %cst_69 : f32 to vector<1x128xf32>
    %112 = arith.select %110, %108, %111 : vector<1x128xi1>, vector<1x128xf32>
    %cst_70 = arith.constant dense<0xFF800000> : vector<1xf32>
    %113 = vector.multi_reduction <maximumf>, %112, %cst_70 [1] : vector<1x128xf32> to vector<1xf32>
    %114 = vector.shape_cast %113 : vector<1xf32> to vector<1x1xf32>
    %115 = vector.broadcast %114 : vector<1x1xf32> to vector<1x128xf32>
    %116 = arith.subf %112, %115 : vector<1x128xf32>
    %117 = math.exp %116 : vector<1x128xf32>
    %cst_71 = arith.constant dense<0.000000e+00> : vector<1xf32>
    %118 = vector.multi_reduction <add>, %117, %cst_71 [1] : vector<1x128xf32> to vector<1xf32>
    %119 = vector.shape_cast %118 : vector<1xf32> to vector<1x1xf32>
    %120 = math.log %119 : vector<1x1xf32>
    %121 = arith.addf %120, %114 : vector<1x1xf32>
    %122 = vector.broadcast %121 : vector<1x1xf32> to vector<1x128xf32>
    %123 = arith.subf %112, %122 : vector<1x128xf32>
    %cst_72 = arith.constant 0.000000e+00 : f32
    %124 = vector.broadcast %cst_72 : f32 to vector<5x128xf32>
    %125 = tpu.concatenate %123, %102, %39, %124 in 0 : vector<1x128xf32>, vector<1x128xf32>, vector<1x128xf32>, vector<5x128xf32> -> vector<8x128xf32>
    %c0_73 = arith.constant 0 : index
    %c0_74 = arith.constant 0 : index
    %c0_75 = arith.constant 0 : index
    %126 = vector.load %arg7[%c0_73, %c0_74, %c0_75] : memref<1x8x128xf32, #tpu.memory_space<vmem>>, vector<1x8x128xf32>
    %127 = vector.shape_cast %126 : vector<1x8x128xf32> to vector<8x128xf32>
    %128 = vector.shape_cast %125 : vector<8x128xf32> to vector<1x8x128xf32>
    tpu.vector_store %arg7[%c0_73, %c0_74, %c0_75], %128 {strides = array<i32>} : memref<1x8x128xf32, #tpu.memory_space<vmem>>, vector<1x8x128xf32>,
    return
  }
  func.func @transform_0(%arg0: i32, %arg1: memref<1xi32, #tpu.memory_space<smem>>) -> (i32, i32) {
    %c0_i32 = arith.constant 0 : i32
    %c0_i32_0 = arith.constant 0 : i32
    %c0_i32_1 = arith.constant 0 : i32
    return %c0_i32, %c0_i32_0 : i32, i32
  }
  func.func @transform_1(%arg0: i32, %arg1: memref<1xi32, #tpu.memory_space<smem>>) -> (i32, i32) {
    %c0_i32 = arith.constant 0 : i32
    %c0_i32_0 = arith.constant 0 : i32
    %c0_i32_1 = arith.constant 0 : i32
    return %c0_i32, %c0_i32_0 : i32, i32
  }
  func.func @transform_2(%arg0: i32, %arg1: memref<1xi32, #tpu.memory_space<smem>>) -> (i32, i32, i32) {
    %c0_i32 = arith.constant 0 : i32
    %c0_i32_0 = arith.constant 0 : i32
    %c0_i32_1 = arith.constant 0 : i32
    %c0_i32_2 = arith.constant 0 : i32
    return %c0_i32, %c0_i32_0, %c0_i32_1 : i32, i32, i32
  }
  func.func @transform_3(%arg0: i32, %arg1: memref<1xi32, #tpu.memory_space<smem>>) -> (i32, i32) {
    %c0_i32 = arith.constant 0 : i32
    %c0_i32_0 = arith.constant 0 : i32
    %c0_i32_1 = arith.constant 0 : i32
    return %c0_i32, %c0_i32_0 : i32, i32
  }
  func.func @transform_4(%arg0: i32, %arg1: memref<1xi32, #tpu.memory_space<smem>>) -> (i32, i32) {
    %c0_i32 = arith.constant 0 : i32
    %c0_i32_0 = arith.constant 0 : i32
    %c0_i32_1 = arith.constant 0 : i32
    return %c0_i32, %c0_i32_0 : i32, i32
  }
  func.func @transform_5(%arg0: i32, %arg1: memref<1xi32, #tpu.memory_space<smem>>) -> (i32, i32, i32) {
    %c0_i32 = arith.constant 0 : i32
    %c0_i32_0 = arith.constant 0 : i32
    %c0_i32_1 = arith.constant 0 : i32
    return %arg0, %c0_i32, %c0_i32_0 : i32, i32, i32
  }
}

</mosaic_0001>

<bundles_post_ra>
// kernel: tpu_custom_call.1
= control target key start
LH: loop header
LB: loop body
LE: loop exit
PB: predicated region body
PF: predicated region fallthrough
CT: control target
= control target key end

     0   :  { %12 = vsyncpa [#allocation6], 0  ;;  %s2480_s0 = inlined_call_operand.<no memory space> [shape: s32[1], index: 0, kind: input, shape index: {}]   ;;  %s2481_s1 = inlined_call_operand.hbm [shape: f32[128,128], index: 1, kind: input, shape index: {}]   ;;  %s2482_s2 = inlined_call_operand.hbm [shape: f32[128,128], index: 2, kind: input, shape index: {}]   ;;  %s2483_s3 = inlined_call_operand.hbm [shape: f32[11,128,128], index: 3, kind: input, shape index: {}]   ;;  %s2484_s4 = inlined_call_operand.hbm [shape: f32[16,128], index: 4, kind: input, shape index: {}]   ;;  %s2485_s5 = inlined_call_operand.vmem [shape: f32[8,128], index: 5, kind: input, shape index: {}]   ;;  %s2486_s6 = inlined_call_operand.hbm [shape: f32[1,8,128], index: 6, kind: output, shape index: {}]  }
   0x1   :  { %13 = vsyncpa [#allocation9], 0 }
   0x2   :  { %14 = vsyncpa [#allocation12], 0 }
   0x3   :  { %15 = vsyncpa [#allocation7], 0  ;;  %s2132_s21 = smov [#allocation8]   ;;  %s2133_s23 = smov [#allocation5]  }
   0x4   :  { %s33_s22 = sshll.u32 %s2132_s21, 4  ;;  %s21_s24 = sshll.u32 %s2133_s23, 4  ;;  %s34_s22 = int_to_ptr.vmem [resolvable:$true] %s33_s22  ;;  %s22_s24 = int_to_ptr.vmem [resolvable:$true] %s21_s24 }
   0x5   :  { %s2032_s25 = scalar_lea.vmem %s34_s22, 2048  ;;  %p2037_p1 = scmp.lt.s32.totalorder %s34_s22, %s34_s22 }
   0x6   :  { %p2033_p0 = scmp.ne.s32.totalorder %s34_s22, %s2032_s25  ;;  %p2038_p2 = scmp.lt.s32.totalorder %s2032_s25, %s2032_s25 }
   0x8   :  { %p2039_p3 = por %p2038_p2, %p2037_p1 }
   0xa   :  { %p2040_p4 = pnand %p2039_p3, %p2033_p0 }
   0xc   :  { %2043 = shalt.err (!%p2040_p4)
}
   0xd   :  { %s2134_s26 = smov 128   ;;  %s2135_s27 = smov 8  }
   0xe   :  { %39 = dma.hbm_to_vmem [thread:$0]  %s2482_s2, 2048, %s34_s22, [#allocation9], %s2134_s26, %s2134_s26, %s2135_s27  }
   0xf   :  { %s2052_s30 = scalar_lea.vmem %s22_s24, 2048  ;;  %p2057_p6 = scmp.lt.s32.totalorder %s22_s24, %s22_s24 }
  0x10   :  { %p2053_p5 = scmp.ne.s32.totalorder %s22_s24, %s2052_s30  ;;  %p2058_p7 = scmp.lt.s32.totalorder %s2052_s30, %s2052_s30 }
  0x12   :  { %p2059_p8 = por %p2058_p7, %p2057_p6 }
  0x14   :  { %p2060_p9 = pnand %p2059_p8, %p2053_p5 }
  0x16   :  { %2063 = shalt.err (!%p2060_p9)
}
  0x17   :  { %27 = dma.hbm_to_vmem [thread:$0]  %s2481_s1, 2048, %s22_s24, [#allocation6], %s2134_s26, %s2134_s26, %s2135_s27  }
  0x18   :  { %s2136_s9 = smov [#allocation10]   ;;  %s2137_s11 = smov [#allocation11]  }
  0x19   :  { %s45_s10 = sshll.u32 %s2136_s9, 4  ;;  %s57_s12 = sshll.u32 %s2137_s11, 4  ;;  %s46_s10 = int_to_ptr.vmem [resolvable:$true] %s45_s10  ;;  %s58_s12 = int_to_ptr.vmem [resolvable:$true] %s57_s12 }
  0x1a   :  { %s2072_s2 = scalar_lea.vmem %s46_s10, 22528  ;;  %p2077_p11 = scmp.lt.s32.totalorder %s46_s10, %s46_s10 }
  0x1b   :  { %p2073_p10 = scmp.ne.s32.totalorder %s46_s10, %s2072_s2  ;;  %p2078_p12 = scmp.lt.s32.totalorder %s2072_s2, %s2072_s2 }
  0x1d   :  { %p2079_p13 = por %p2078_p12, %p2077_p11 }
  0x1f   :  { %p2080_p0 = pnand %p2079_p13, %p2073_p10 }
  0x21   :  { %2083 = shalt.err (!%p2080_p0)
}
  0x22   :  { %51 = dma.hbm_to_vmem [thread:$0]  %s2483_s3, 22528, %s46_s10, [#allocation9], %s2134_s26, %s2134_s26, %s2135_s27  }
  0x23   :  { %s2092_s1 = scalar_lea.vmem %s58_s12, 256  ;;  %p2097_p2 = scmp.lt.s32.totalorder %s58_s12, %s58_s12 }
  0x24   :  { %p2093_p1 = scmp.ne.s32.totalorder %s58_s12, %s2092_s1  ;;  %p2098_p3 = scmp.lt.s32.totalorder %s2092_s1, %s2092_s1 }
  0x26   :  { %p2099_p4 = por %p2098_p3, %p2097_p2 }
  0x28   :  { %p2100_p5 = pnand %p2099_p4, %p2093_p1 }
  0x2a   :  { %2103 = shalt.err (!%p2100_p5)
}
  0x2b   :  { %63 = dma.hbm_to_vmem [thread:$0]  %s2484_s4, 256, %s58_s12, [#allocation12], %s2134_s26, %s2134_s26, %s2135_s27  }
  0x2c   :  { %2124 = dma.done.wait [#allocation6], 2048  }
  0x2d   :  { %2125 = vsyncadd [#allocation6], 4294965248 }
  0x2e   :  { %2126 = dma.done.wait [#allocation9], 24576  }
  0x2f   :  { %2127 = vsyncadd [#allocation9], 4294942720 }
  0x30   :  { %2128 = dma.done.wait [#allocation12], 256  }
  0x31   :  { %2129 = vsyncadd [#allocation12], 4294967040  ;;  %v2138_v0 = vmov 0.0   ;;  %vm2139_vm0 = vmmov 0   ;;  %v106_v1 = vld [vmem:[#allocation5 + $0x78] sm:$0xff]  ;;  %v105_v2 = vld [vmem:[#allocation5 + $0x70] sm:$0xff]  ;;  %v84_v23 = vlaneseq  ;;  %v87_v31 = vstv %s2480_s0 }
  0x32   :  { %1540 = vmatprep.subr.mxu0 %v2138_v0  ;;  %1572 = vmatprep.mubr.msk.f32.mxu0 %vm2139_vm0, %v2138_v0  ;;  %v104_v3 = vld [vmem:[#allocation5 + $0x68] sm:$0xff]  ;;  %v103_v4 = vld [vmem:[#allocation5 + $0x60] sm:$0xff]  ;;  %v210_v5 = vld [vmem:[#allocation10 + $0xf8] sm:$0xff]  ;;  %v2140_v36 = vmov 1.0   ;;  %vm355_vm3 = vcmask 1040384   ;;  %vm1293_vm5 = vcmask 1041408  }
  0x33   :  { %1575 = vmatprep.subr.mxu1 %v2138_v0  ;;  %1607 = vmatprep.mubr.msk.f32.mxu1 %vm2139_vm0, %v2138_v0  ;;  %v209_v6 = vld [vmem:[#allocation10 + $0xf0] sm:$0xff]  ;;  %v102_v7 = vld [vmem:[#allocation5 + $0x58] sm:$0xff]  ;;  %v208_v8 = vld [vmem:[#allocation10 + $0xe8] sm:$0xff]  ;;  %v2231_v28 = vand.u32 127, %v84_v23  ;;  %s2141_s0 = smov [#allocation13]   ;;  %vm1295_vm6 = vcmask 1042432  }
  0x34   :  { %1541 = vmatpush3.msra.mxu0 %v106_v1  ;;  %1576 = vmatpush3.msra.mxu1 %v210_v5  ;;  %v101_v9 = vld [vmem:[#allocation5 + $0x50] sm:$0xff]  ;;  %v207_v10 = vld [vmem:[#allocation10 + $0xe0] sm:$0xff]  ;;  %v100_v11 = vld [vmem:[#allocation5 + $0x48] sm:$0xff]  ;;  %s1304_s18 = sshll.u32 %s2141_s0, 4  ;;  %s1305_s18 = int_to_ptr.vmem [resolvable:$true] %s1304_s18 }
  0x35   :  { %1542 = vmatprep.subr.mxu0 %v2138_v0  ;;  %1577 = vmatprep.subr.mxu1 %v2138_v0  ;;  %v206_v12 = vld [vmem:[#allocation10 + $0xd8] sm:$0xff]  ;;  %v99_v13 = vld [vmem:[#allocation5 + $0x40] sm:$0xff]  ;;  %v205_v14 = vld [vmem:[#allocation10 + $0xd0] sm:$0xff]  ;;  %vm88_vm1 = vcmp.eq.s32.totalorder %v2231_v28, %v87_v31  ;;  %vm353_vm2 = vcmp.lt.s32.totalorder %v2231_v28, 10  ;;  %vm1271_vm4 = vcmp.lt.s32.totalorder %v2231_v28, 20  ;;  %s2104_s19 = scalar_lea.vmem %s1305_s18, 128  ;;  %p2109_p7 = scmp.lt.s32.totalorder %s1305_s18, %s1305_s18 }
  0x36   :  { %1543 = vmatpush3.msra.mxu0 %v105_v2  ;;  %1578 = vmatpush3.msra.mxu1 %v209_v6  ;;  %v98_v15 = vld [vmem:[#allocation5 + $0x38] sm:$0xff]  ;;  %v204_v16 = vld [vmem:[#allocation10 + $0xc8] sm:$0xff]  ;;  %v97_v18 = vld [vmem:[#allocation5 + $0x30] sm:$0xff]  ;;  %p2105_p6 = scmp.ne.s32.totalorder %s1305_s18, %s2104_s19  ;;  %p2110_p8 = scmp.lt.s32.totalorder %s2104_s19, %s2104_s19 }
  0x37   :  { %1544 = vmatprep.subr.mxu0 %v2138_v0  ;;  %1579 = vmatprep.subr.mxu1 %v2138_v0  ;;  %v82_v17 = vld [vmem:[%s2485_s5] sm:$0x1]  ;;  %v203_v19 = vld [vmem:[#allocation10 + $0xc0] sm:$0xff]  ;;  %v96_v20 = vld [vmem:[#allocation5 + $0x28] sm:$0xff] }
  0x38   :  { %1545 = vmatpush3.msra.mxu0 %v104_v3  ;;  %1580 = vmatpush3.msra.mxu1 %v208_v8  ;;  %83 = vst [vmem:[#allocation2] sm:$0x1] %v82_v17  ;;  %v202_v21 = vld [vmem:[#allocation10 + $0xb8] sm:$0xff]  ;;  %v95_v22 = vld [vmem:[#allocation5 + $0x20] sm:$0xff]  ;;  %v201_v24 = vld [vmem:[#allocation10 + $0xb0] sm:$0xff]  ;;  %p2111_p9 = por %p2110_p8, %p2109_p7 }
  0x39   :  { %1546 = vmatprep.subr.mxu0 %v2138_v0  ;;  %1581 = vmatprep.subr.mxu1 %v2138_v0  ;;  %v94_v25 = vld [vmem:[#allocation5 + $0x18] sm:$0xff]  ;;  %v200_v26 = vld [vmem:[#allocation10 + $0xa8] sm:$0xff]  ;;  %v93_v27 = vld [vmem:[#allocation5 + $0x10] sm:$0xff] }
  0x3a   :  { %1547 = vmatpush3.msra.mxu0 %v103_v4  ;;  %1582 = vmatpush3.msra.mxu1 %v207_v10  ;;  %v199_v29 = vld [vmem:[#allocation10 + $0xa0] sm:$0xff]  ;;  %v92_v30 = vld [vmem:[#allocation5 + $0x8] sm:$0xff]  ;;  %v198_v32 = vld [vmem:[#allocation10 + $0x98] sm:$0xff]  ;;  %p2112_p10 = pnand %p2111_p9, %p2105_p6 }
  0x3b   :  { %1548 = vmatprep.subr.mxu0 %v2138_v0  ;;  %1583 = vmatprep.subr.mxu1 %v2138_v0  ;;  %v91_v33 = vld [vmem:[#allocation5] sm:$0xff]  ;;  %v193_v34 = vld [vmem:[#allocation10 + $0x78] sm:$0xff]  ;;  %v197_v35 = vld [vmem:[#allocation10 + $0x90] sm:$0xff] }
  0x3c   :  { %1549 = vmatpush3.msra.mxu0 %v102_v7  ;;  %1584 = vmatpush3.msra.mxu1 %v206_v12  ;;  %v192_v37 = vld [vmem:[#allocation10 + $0x70] sm:$0xff]  ;;  %v196_v38 = vld [vmem:[#allocation10 + $0x88] sm:$0xff]  ;;  %v195_v40 = vld [vmem:[#allocation10 + $0x80] sm:$0xff] }
  0x3d   :  { %1550 = vmatprep.subr.mxu0 %v2138_v0  ;;  %1585 = vmatprep.subr.mxu1 %v2138_v0  ;;  %v191_v39 = vld [vmem:[#allocation10 + $0x68] sm:$0xff]  ;;  %v190_v42 = vld [vmem:[#allocation10 + $0x60] sm:$0xff]  ;;  %v189_v43 = vld [vmem:[#allocation10 + $0x58] sm:$0xff] }
  0x3e   :  { %1551 = vmatpush3.msra.mxu0 %v101_v9  ;;  %1586 = vmatpush3.msra.mxu1 %v205_v14  ;;  %v188_v44 = vld [vmem:[#allocation10 + $0x50] sm:$0xff]  ;;  %v187_v45 = vld [vmem:[#allocation10 + $0x48] sm:$0xff]  ;;  %v186_v46 = vld [vmem:[#allocation10 + $0x40] sm:$0xff] }
  0x3f   :  { %1552 = vmatprep.subr.mxu0 %v2138_v0  ;;  %1587 = vmatprep.subr.mxu1 %v2138_v0  ;;  %v2247_v41 = vld [vmem:[#allocation2] sm:$0x1]  ;;  %v184_v48 = vld [vmem:[#allocation10 + $0x30] sm:$0xff]  ;;  %v183_v49 = vld [vmem:[#allocation10 + $0x28] sm:$0xff] }
  0x40   :  { %1553 = vmatpush3.msra.mxu0 %v100_v11  ;;  %1588 = vmatpush3.msra.mxu1 %v204_v16  ;;  %v185_v47 = vld [vmem:[#allocation10 + $0x38] sm:$0xff]  ;;  %v182_v50 = vld [vmem:[#allocation10 + $0x20] sm:$0xff]  ;;  %v180_v52 = vld [vmem:[#allocation10 + $0x10] sm:$0xff] }
  0x41   :  { %1554 = vmatprep.subr.mxu0 %v2138_v0  ;;  %1589 = vmatprep.subr.mxu1 %v2138_v0  ;;  %v181_v51 = vld [vmem:[#allocation10 + $0x18] sm:$0xff]  ;;  %v179_v53 = vld [vmem:[#allocation10 + $0x8] sm:$0xff]  ;;  %v178_v54 = vld [vmem:[#allocation10] sm:$0xff] }
  0x42   :  { %1555 = vmatpush3.msra.mxu0 %v99_v13  ;;  %1590 = vmatpush3.msra.mxu1 %v203_v19  ;;  %v351_v60 = vld [vmem:[#allocation11] sm:$0x1]  ;;  %v385_v3 = vld [vmem:[#allocation8 + $0x78] sm:$0xff]  ;;  %v384_v4 = vld [vmem:[#allocation8 + $0x70] sm:$0xff] }
  0x43   :  { %1556 = vmatprep.subr.mxu0 %v2138_v0  ;;  %1591 = vmatprep.subr.mxu1 %v2138_v0  ;;  %v383_v5 = vld [vmem:[#allocation8 + $0x68] sm:$0xff]  ;;  %v382_v6 = vld [vmem:[#allocation8 + $0x60] sm:$0xff]  ;;  %v381_v7 = vld [vmem:[#allocation8 + $0x58] sm:$0xff] }
  0x44   :  { %1557 = vmatpush3.msra.mxu0 %v98_v15  ;;  %1592 = vmatpush3.msra.mxu1 %v202_v21  ;;  %v380_v13 = vld [vmem:[#allocation8 + $0x50] sm:$0xff]  ;;  %v379_v14 = vld [vmem:[#allocation8 + $0x48] sm:$0xff]  ;;  %v378_v15 = vld [vmem:[#allocation8 + $0x40] sm:$0xff] }
  0x45   :  { %1558 = vmatprep.subr.mxu0 %v2138_v0  ;;  %1593 = vmatprep.subr.mxu1 %v2138_v0  ;;  %v377_v16 = vld [vmem:[#allocation8 + $0x38] sm:$0xff]  ;;  %v376_v17 = vld [vmem:[#allocation8 + $0x30] sm:$0xff]  ;;  %v374_v19 = vld [vmem:[#allocation8 + $0x20] sm:$0xff] }
  0x46   :  { %1559 = vmatpush3.msra.mxu0 %v97_v18  ;;  %1594 = vmatpush3.msra.mxu1 %v201_v24  ;;  %v375_v18 = vld [vmem:[#allocation8 + $0x28] sm:$0xff]  ;;  %v372_v21 = vld [vmem:[#allocation8 + $0x10] sm:$0xff]  ;;  %v370_v23 = vld [vmem:[#allocation8] sm:$0xff] }
  0x47   :  { %1560 = vmatprep.subr.mxu0 %v2138_v0  ;;  %1595 = vmatprep.subr.mxu1 %v2138_v0  ;;  %v489_v24 = vld [vmem:[#allocation10 + $0x1f8] sm:$0xff]  ;;  %v483_v31 = vld [vmem:[#allocation10 + $0x1c8] sm:$0xff] }
  0x48   :  { %1561 = vmatpush3.msra.mxu0 %v96_v20  ;;  %1596 = vmatpush3.msra.mxu1 %v200_v26  ;;  %v373_v20 = vld [vmem:[#allocation8 + $0x18] sm:$0xff]  ;;  %v487_v26 = vld [vmem:[#allocation10 + $0x1e8] sm:$0xff] }
  0x49   :  { %1562 = vmatprep.subr.mxu0 %v2138_v0  ;;  %1597 = vmatprep.subr.mxu1 %v2138_v0 }
  0x4a   :  { %1563 = vmatpush3.msra.mxu0 %v95_v22  ;;  %1598 = vmatpush3.msra.mxu1 %v199_v29  ;;  %v371_v22 = vld [vmem:[#allocation8 + $0x8] sm:$0xff]  ;;  %v485_v29 = vld [vmem:[#allocation10 + $0x1d8] sm:$0xff] }
  0x4b   :  { %1564 = vmatprep.subr.mxu0 %v2138_v0  ;;  %1599 = vmatprep.subr.mxu1 %v2138_v0 }
  0x4c   :  { %1565 = vmatpush3.msra.mxu0 %v94_v25  ;;  %1600 = vmatpush3.msra.mxu1 %v198_v32  ;;  %v488_v25 = vld [vmem:[#allocation10 + $0x1f0] sm:$0xff]  ;;  %v482_v32 = vld [vmem:[#allocation10 + $0x1c0] sm:$0xff] }
  0x4d   :  { %1566 = vmatprep.subr.mxu0 %v2138_v0  ;;  %1601 = vmatprep.subr.mxu1 %v2138_v0 }
  0x4e   :  { %1567 = vmatpush3.msra.mxu0 %v93_v27  ;;  %1602 = vmatpush3.msra.mxu1 %v197_v35  ;;  %v486_v27 = vld [vmem:[#allocation10 + $0x1e0] sm:$0xff]  ;;  %v479_v35 = vld [vmem:[#allocation10 + $0x1a8] sm:$0xff] }
  0x4f   :  { %1568 = vmatprep.subr.mxu0 %v2138_v0  ;;  %1603 = vmatprep.subr.mxu1 %v2138_v0 }
  0x50   :  { %1569 = vmatpush3.msra.mxu0 %v92_v30  ;;  %1604 = vmatpush3.msra.mxu1 %v196_v38  ;;  %v484_v30 = vld [vmem:[#allocation10 + $0x1d0] sm:$0xff] }
  0x51   :  { %1570 = vmatprep.subr.mxu0 %v2138_v0  ;;  %1605 = vmatprep.subr.mxu1 %v2138_v0  ;;  %v476_v38 = vld [vmem:[#allocation10 + $0x190] sm:$0xff] }
  0x52   :  { %1571 = vmatpush3.msra.mxu0 %v91_v33  ;;  %1606 = vmatpush3.msra.mxu1 %v195_v40  ;;  %v481_v33 = vld [vmem:[#allocation10 + $0x1b8] sm:$0xff] }
  0x53   :  { %1573 = vmatmul.mubr.msk.f32.vlgmr.msra.gmra.mxu0 %vm88_vm1, %v2140_v36  ;;  %1610 = vmatprep.subr.mxu0 %v2138_v0  ;;  %v478_v36 = vld [vmem:[#allocation10 + $0x1a0] sm:$0xff] }
  0x54   :  { %1611 = vmatpush3.msra.mxu0 %v193_v34  ;;  %1608 = vmatmul.mubr.f32.vlgmr.msra.gmra.mxu1 %v2247_v41  ;;  %v480_v34 = vld [vmem:[#allocation10 + $0x1b0] sm:$0xff] }
  0x55   :  { %1612 = vmatprep.subr.mxu0 %v2138_v0  ;;  %1642 = vmatprep.mubr.msk.f32.mxu0 %vm2139_vm0, %v2138_v0 }
  0x56   :  { %1613 = vmatpush3.msra.mxu0 %v192_v37  ;;  %1645 = vmatprep.subr.mxu1 %v2138_v0  ;;  %v477_v37 = vld [vmem:[#allocation10 + $0x198] sm:$0xff] }
  0x57   :  { %1614 = vmatprep.subr.mxu0 %v2138_v0  ;;  %1677 = vmatprep.mubr.msk.f32.mxu1 %vm2139_vm0, %v2138_v0 }
  0x58   :  { %1615 = vmatpush3.msra.mxu0 %v191_v39  ;;  %1646 = vmatpush3.msra.mxu1 %v385_v3  ;;  %v475_v39 = vld [vmem:[#allocation10 + $0x188] sm:$0xff]  ;;  %v736_v3 = vld [vmem:[#allocation10 + $0x2f0] sm:$0xff] }
  0x59   :  { %1616 = vmatprep.subr.mxu0 %v2138_v0  ;;  %1647 = vmatprep.subr.mxu1 %v2138_v0 }
  0x5a   :  { %1617 = vmatpush3.msra.mxu0 %v190_v42  ;;  %1648 = vmatpush3.msra.mxu1 %v384_v4  ;;  %v735_v4 = vld [vmem:[#allocation10 + $0x2e8] sm:$0xff] }
  0x5b   :  { %1618 = vmatprep.subr.mxu0 %v2138_v0  ;;  %1649 = vmatprep.subr.mxu1 %v2138_v0 }
  0x5c   :  { %1619 = vmatpush3.msra.mxu0 %v189_v43  ;;  %1650 = vmatpush3.msra.mxu1 %v383_v5  ;;  %v734_v5 = vld [vmem:[#allocation10 + $0x2e0] sm:$0xff] }
  0x5d   :  { %1620 = vmatprep.subr.mxu0 %v2138_v0  ;;  %1651 = vmatprep.subr.mxu1 %v2138_v0 }
  0x5e   :  { %1621 = vmatpush3.msra.mxu0 %v188_v44  ;;  %1652 = vmatpush3.msra.mxu1 %v382_v6  ;;  %v732_v6 = vld [vmem:[#allocation10 + $0x2d0] sm:$0xff] }
  0x5f   :  { %1622 = vmatprep.subr.mxu0 %v2138_v0  ;;  %1653 = vmatprep.subr.mxu1 %v2138_v0 }
  0x60   :  { %1623 = vmatpush3.msra.mxu0 %v187_v45  ;;  %1654 = vmatpush3.msra.mxu1 %v381_v7  ;;  %v731_v7 = vld [vmem:[#allocation10 + $0x2c8] sm:$0xff] }
  0x61   :  { %1624 = vmatprep.subr.mxu0 %v2138_v0  ;;  %1655 = vmatprep.subr.mxu1 %v2138_v0 }
  0x62   :  { %1625 = vmatpush3.msra.mxu0 %v186_v46  ;;  %1656 = vmatpush3.msra.mxu1 %v380_v13  ;;  %v725_v13 = vld [vmem:[#allocation10 + $0x298] sm:$0xff] }
  0x63   :  { %1626 = vmatprep.subr.mxu0 %v2138_v0  ;;  %1657 = vmatprep.subr.mxu1 %v2138_v0 }
  0x64   :  { %1627 = vmatpush3.msra.mxu0 %v185_v47  ;;  %1658 = vmatpush3.msra.mxu1 %v379_v14  ;;  %v472_v47 = vld [vmem:[#allocation10 + $0x178] sm:$0xff] }
  0x65   :  { %1628 = vmatprep.subr.mxu0 %v2138_v0  ;;  %1659 = vmatprep.subr.mxu1 %v2138_v0  ;;  %v649_v14 = vld [vmem:[#allocation10 + $0x278] sm:$0xff] }
  0x66   :  { %1629 = vmatpush3.msra.mxu0 %v184_v48  ;;  %1660 = vmatpush3.msra.mxu1 %v378_v15  ;;  %v471_v48 = vld [vmem:[#allocation10 + $0x170] sm:$0xff] }
  0x67   :  { %1630 = vmatprep.subr.mxu0 %v2138_v0  ;;  %1661 = vmatprep.subr.mxu1 %v2138_v0 }
  0x68   :  { %1631 = vmatpush3.msra.mxu0 %v183_v49  ;;  %1662 = vmatpush3.msra.mxu1 %v377_v16  ;;  %v470_v49 = vld [vmem:[#allocation10 + $0x168] sm:$0xff]  ;;  %v648_v16 = vld [vmem:[#allocation10 + $0x270] sm:$0xff] }
  0x69   :  { %1632 = vmatprep.subr.mxu0 %v2138_v0  ;;  %1663 = vmatprep.subr.mxu1 %v2138_v0 }
  0x6a   :  { %1633 = vmatpush3.msra.mxu0 %v182_v50  ;;  %1664 = vmatpush3.msra.mxu1 %v376_v17  ;;  %v469_v50 = vld [vmem:[#allocation10 + $0x160] sm:$0xff] }
  0x6b   :  { %1634 = vmatprep.subr.mxu0 %v2138_v0  ;;  %1665 = vmatprep.subr.mxu1 %v2138_v0 }
  0x6c   :  { %1635 = vmatpush3.msra.mxu0 %v181_v51  ;;  %1666 = vmatpush3.msra.mxu1 %v375_v18  ;;  %v468_v51 = vld [vmem:[#allocation10 + $0x158] sm:$0xff]  ;;  %v647_v18 = vld [vmem:[#allocation10 + $0x268] sm:$0xff] }
  0x6d   :  { %1636 = vmatprep.subr.mxu0 %v2138_v0  ;;  %1667 = vmatprep.subr.mxu1 %v2138_v0 }
  0x6e   :  { %1637 = vmatpush3.msra.mxu0 %v180_v52  ;;  %1668 = vmatpush3.msra.mxu1 %v374_v19  ;;  %v467_v52 = vld [vmem:[#allocation10 + $0x150] sm:$0xff]  ;;  %v646_v19 = vld [vmem:[#allocation10 + $0x260] sm:$0xff] }
  0x6f   :  { %1638 = vmatprep.subr.mxu0 %v2138_v0  ;;  %1669 = vmatprep.subr.mxu1 %v2138_v0 }
  0x70   :  { %1639 = vmatpush3.msra.mxu0 %v179_v53  ;;  %1670 = vmatpush3.msra.mxu1 %v373_v20  ;;  %v466_v53 = vld [vmem:[#allocation10 + $0x148] sm:$0xff]  ;;  %v645_v20 = vld [vmem:[#allocation10 + $0x258] sm:$0xff] }
  0x71   :  { %1640 = vmatprep.subr.mxu0 %v2138_v0  ;;  %1671 = vmatprep.subr.mxu1 %v2138_v0 }
  0x72   :  { %1641 = vmatpush3.msra.mxu0 %v178_v54  ;;  %1672 = vmatpush3.msra.mxu1 %v372_v21  ;;  %v465_v54 = vld [vmem:[#allocation10 + $0x140] sm:$0xff]  ;;  %v644_v21 = vld [vmem:[#allocation10 + $0x250] sm:$0xff] }
  0x73   :  { %1680 = vmatprep.subr.mxu0 %v2138_v0  ;;  %1673 = vmatprep.subr.mxu1 %v2138_v0 }
  0x74   :  { %1674 = vmatpush3.msra.mxu1 %v371_v22  ;;  %v643_v22 = vld [vmem:[#allocation10 + $0x248] sm:$0xff] }
  0x75   :  { %1675 = vmatprep.subr.mxu1 %v2138_v0 }
  0x76   :  { %1676 = vmatpush3.msra.mxu1 %v370_v23  ;;  %v642_v23 = vld [vmem:[#allocation10 + $0x240] sm:$0xff] }
  0x77   :  { %1715 = vmatprep.subr.mxu1 %v2138_v0 }
 0x113   :  { %v2271_v55 = vpop.f32.mrf.mxu0 }
 0x114   :  { %1643 = vmatmul.mubr.f32.vlgmr.msra.gmra.mxu0 %v2271_v55  ;;  %v277_v57 = vpop.f32.mrf.mxu1 }
 0x115   :  { %v1574_v56 = vpop.f32.mrf.mxu0  ;;  %1712 = vmatprep.mubr.msk.f32.mxu0 %vm2139_vm0, %v2138_v0  ;;  %1681 = vmatpush3.msra.mxu0 %v489_v24  ;;  %v641_v24 = vld [vmem:[#allocation10 + $0x238] sm:$0xff] }
 0x116   :  { %v1609_v58 = vpop.f32.mrf.mxu1  ;;  %1682 = vmatprep.subr.mxu0 %v2138_v0  ;;  %v464_v56 = vld [vmem:[#allocation10 + $0x138] sm:$0xff] }
 0x117   :  { %1683 = vmatpush3.msra.mxu0 %v488_v25  ;;  %v462_v58 = vld [vmem:[#allocation10 + $0x128] sm:$0xff]  ;;  %v640_v25 = vld [vmem:[#allocation10 + $0x230] sm:$0xff] }
 0x118   :  { %1684 = vmatprep.subr.mxu0 %v2138_v0 }
 0x119   :  { %1685 = vmatpush3.msra.mxu0 %v487_v26  ;;  %v639_v26 = vld [vmem:[#allocation10 + $0x228] sm:$0xff] }
 0x11a   :  { %1686 = vmatprep.subr.mxu0 %v2138_v0 }
 0x11b   :  { %1687 = vmatpush3.msra.mxu0 %v486_v27  ;;  %v638_v27 = vld [vmem:[#allocation10 + $0x220] sm:$0xff] }
 0x11c   :  { %1688 = vmatprep.subr.mxu0 %v2138_v0 }
 0x11d   :  { %1689 = vmatpush3.msra.mxu0 %v485_v29  ;;  %v637_v29 = vld [vmem:[#allocation10 + $0x218] sm:$0xff] }
 0x11e   :  { %1690 = vmatprep.subr.mxu0 %v2138_v0 }
 0x11f   :  { %1691 = vmatpush3.msra.mxu0 %v484_v30 }
 0x120   :  { %1692 = vmatprep.subr.mxu0 %v2138_v0 }
 0x121   :  { %1693 = vmatpush3.msra.mxu0 %v483_v31 }
 0x122   :  { %1694 = vmatprep.subr.mxu0 %v2138_v0 }
 0x123   :  { %1695 = vmatpush3.msra.mxu0 %v482_v32  ;;  %v636_v32 = vld [vmem:[#allocation10 + $0x210] sm:$0xff] }
 0x124   :  { %1696 = vmatprep.subr.mxu0 %v2138_v0 }
 0x125   :  { %1697 = vmatpush3.msra.mxu0 %v481_v33  ;;  %v724_v33 = vld [vmem:[#allocation10 + $0x290] sm:$0xff] }
 0x126   :  { %1698 = vmatprep.subr.mxu0 %v2138_v0 }
 0x127   :  { %1699 = vmatpush3.msra.mxu0 %v480_v34  ;;  %v635_v34 = vld [vmem:[#allocation10 + $0x208] sm:$0xff] }
 0x128   :  { %1700 = vmatprep.subr.mxu0 %v2138_v0 }
 0x129   :  { %1701 = vmatpush3.msra.mxu0 %v479_v35  ;;  %v723_v35 = vld [vmem:[#allocation10 + $0x288] sm:$0xff] }
 0x12a   :  { %1702 = vmatprep.subr.mxu0 %v2138_v0 }
 0x12b   :  { %1703 = vmatpush3.msra.mxu0 %v478_v36  ;;  %v634_v36 = vld [vmem:[#allocation10 + $0x200] sm:$0xff] }
 0x12c   :  { %1704 = vmatprep.subr.mxu0 %v2138_v0 }
 0x12d   :  { %1705 = vmatpush3.msra.mxu0 %v477_v37  ;;  %v722_v37 = vld [vmem:[#allocation10 + $0x280] sm:$0xff] }
 0x12e   :  { %1706 = vmatprep.subr.mxu0 %v2138_v0 }
 0x12f   :  { %1707 = vmatpush3.msra.mxu0 %v476_v38 }
 0x130   :  { %1708 = vmatprep.subr.mxu0 %v2138_v0 }
 0x131   :  { %1709 = vmatpush3.msra.mxu0 %v475_v39  ;;  %v630_v39 = vld [vmem:[#allocation11 + $0x1] sm:$0x1] }
 0x132   :  { %1710 = vmatprep.subr.mxu0 %v2138_v0 }
 0x1d4   :  { %v347_v59 = vpop.f32.mrf.mxu0 }
 0x1d5   :  { %v348_v61 = vadd.f32 %v347_v59, %v277_v57  ;;  %v463_v57 = vld [vmem:[#allocation10 + $0x130] sm:$0xff]  ;;  %v461_v59 = vld [vmem:[#allocation10 + $0x120] sm:$0xff] }
 0x1d6   :  { %v1644_v62 = vpop.f32.mrf.mxu0 }
 0x1d7   :  { %v352_v63 = vadd.f32 %v351_v60, %v348_v61  ;;  %v460_v60 = vld [vmem:[#allocation10 + $0x118] sm:$0xff]  ;;  %v459_v61 = vld [vmem:[#allocation10 + $0x110] sm:$0xff]  ;;  %v458_v62 = vld [vmem:[#allocation10 + $0x108] sm:$0xff] }
 0x1d9   :  { %v354_v1 = vsel %vm353_vm2, %v352_v63, -1e+30  ;;  %v457_v63 = vld [vmem:[#allocation10 + $0x100] sm:$0xff] }
 0x1da   :  { %v356_v2 = vsel %vm355_vm3, %v354_v1, -inf }
 0x1db   :  { %357 = vmax.xlane.f32.xlu0 %v356_v2  ;;  %v737_v2 = vld [vmem:[#allocation10 + $0x2f8] sm:$0xff] }
 0x264   :  { %v358_v8 = vpop.xlane.xlu0 %357 }
 0x265   :  { %v359_v9 = vsub.f32 %v354_v1, %v358_v8  ;;  %v474_v1 = vld [vmem:[#allocation10 + $0x180] sm:$0xff] }
 0x266   :  { %1711 = vmatpush3.msra.mxu0 %v474_v1  ;;  %v730_v8 = vld [vmem:[#allocation10 + $0x2c0] sm:$0xff]  ;;  %v905_v1 = vld [vmem:[#allocation10 + $0x3b8] sm:$0xff] }
 0x267   :  { %v360_v10 = vmul.f32 1.442695, %v359_v9  ;;  %1750 = vmatprep.subr.mxu0 %v2138_v0  ;;  %v729_v9 = vld [vmem:[#allocation10 + $0x2b8] sm:$0xff] }
 0x269   :  { %2005 = vpow2.f32 %v360_v10  ;;  %v728_v10 = vld [vmem:[#allocation10 + $0x2b0] sm:$0xff] }
 0x276   :  { %v2283_v11 = vpop.eup %2005 }
 0x277   :  { %v362_v12 = vsel %vm355_vm3, %v2283_v11, 0.0 }
 0x278   :  { %363 = vadd.xlane.f32.xlu0 %v362_v12  ;;  %v726_v12 = vld [vmem:[#allocation10 + $0x2a0] sm:$0xff] }
 0x301   :  { %v364_v40 = vpop.xlane.xlu0 %363 }
 0x302   :  { %2007 = vrcp.f32 %v364_v40 }
 0x30f   :  { %v2008_v42 = vpop.eup %2007 }
 0x310   :  { %v366_v43 = vmul.f32 %v2008_v42, %v364_v40 }
 0x312   :  { %v367_v44 = vsub.f32 2.0, %v366_v43 }
 0x314   :  { %v368_v45 = vmul.f32 %v2008_v42, %v367_v44 }
 0x316   :  { %v2314_v46 = vmul.f32 %v2283_v11, %v368_v45  ;;  %v727_v11 = vld [vmem:[#allocation10 + $0x2a8] sm:$0xff]  ;;  %v825_v45 = vld [vmem:[#allocation10 + $0x378] sm:$0xff] }
 0x318   :  { %1678 = vmatmul.mubr.f32.vlgmr.msra.gmra.mxu1 %v2314_v46 }
 0x319   :  { %1716 = vmatpush3.msra.mxu1 %v472_v47  ;;  %1747 = vmatprep.mubr.msk.f32.mxu1 %vm2139_vm0, %v2138_v0  ;;  %v913_v47 = vld [vmem:[#allocation10 + $0x3f8] sm:$0xff] }
 0x31a   :  { %1717 = vmatprep.subr.mxu1 %v2138_v0 }
 0x31b   :  { %1718 = vmatpush3.msra.mxu1 %v471_v48  ;;  %v824_v48 = vld [vmem:[#allocation10 + $0x370] sm:$0xff] }
 0x31c   :  { %1719 = vmatprep.subr.mxu1 %v2138_v0 }
 0x31d   :  { %1720 = vmatpush3.msra.mxu1 %v470_v49  ;;  %v912_v49 = vld [vmem:[#allocation10 + $0x3f0] sm:$0xff] }
 0x31e   :  { %1721 = vmatprep.subr.mxu1 %v2138_v0 }
 0x31f   :  { %1722 = vmatpush3.msra.mxu1 %v469_v50  ;;  %v823_v50 = vld [vmem:[#allocation10 + $0x368] sm:$0xff] }
 0x320   :  { %1723 = vmatprep.subr.mxu1 %v2138_v0 }
 0x321   :  { %1724 = vmatpush3.msra.mxu1 %v468_v51  ;;  %v911_v51 = vld [vmem:[#allocation10 + $0x3e8] sm:$0xff] }
 0x322   :  { %1725 = vmatprep.subr.mxu1 %v2138_v0 }
 0x323   :  { %1726 = vmatpush3.msra.mxu1 %v467_v52  ;;  %v822_v52 = vld [vmem:[#allocation10 + $0x360] sm:$0xff] }
 0x324   :  { %1727 = vmatprep.subr.mxu1 %v2138_v0 }
 0x325   :  { %1728 = vmatpush3.msra.mxu1 %v466_v53  ;;  %v910_v53 = vld [vmem:[#allocation10 + $0x3e0] sm:$0xff] }
 0x326   :  { %1729 = vmatprep.subr.mxu1 %v2138_v0 }
 0x327   :  { %1730 = vmatpush3.msra.mxu1 %v465_v54  ;;  %v821_v54 = vld [vmem:[#allocation10 + $0x358] sm:$0xff] }
 0x328   :  { %1731 = vmatprep.subr.mxu1 %v2138_v0 }
 0x329   :  { %1732 = vmatpush3.msra.mxu1 %v464_v56  ;;  %v909_v56 = vld [vmem:[#allocation10 + $0x3d8] sm:$0xff] }
 0x32a   :  { %1733 = vmatprep.subr.mxu1 %v2138_v0 }
 0x32b   :  { %1734 = vmatpush3.msra.mxu1 %v463_v57  ;;  %v820_v57 = vld [vmem:[#allocation10 + $0x350] sm:$0xff] }
 0x32c   :  { %1735 = vmatprep.subr.mxu1 %v2138_v0 }
 0x32d   :  { %1736 = vmatpush3.msra.mxu1 %v462_v58  ;;  %v908_v58 = vld [vmem:[#allocation10 + $0x3d0] sm:$0xff] }
 0x32e   :  { %1737 = vmatprep.subr.mxu1 %v2138_v0 }
 0x32f   :  { %1738 = vmatpush3.msra.mxu1 %v461_v59  ;;  %v819_v59 = vld [vmem:[#allocation10 + $0x348] sm:$0xff] }
 0x330   :  { %1739 = vmatprep.subr.mxu1 %v2138_v0 }
 0x331   :  { %1740 = vmatpush3.msra.mxu1 %v460_v60  ;;  %v907_v60 = vld [vmem:[#allocation10 + $0x3c8] sm:$0xff] }
 0x332   :  { %1741 = vmatprep.subr.mxu1 %v2138_v0 }
 0x333   :  { %1742 = vmatpush3.msra.mxu1 %v459_v61  ;;  %v818_v61 = vld [vmem:[#allocation10 + $0x340] sm:$0xff] }
 0x334   :  { %1743 = vmatprep.subr.mxu1 %v2138_v0 }
 0x335   :  { %1744 = vmatpush3.msra.mxu1 %v458_v62  ;;  %v906_v62 = vld [vmem:[#allocation10 + $0x3c0] sm:$0xff] }
 0x336   :  { %1745 = vmatprep.subr.mxu1 %v2138_v0 }
 0x337   :  { %1746 = vmatpush3.msra.mxu1 %v457_v63  ;;  %v817_v63 = vld [vmem:[#allocation10 + $0x338] sm:$0xff] }
 0x338   :  { %1748 = vmatmul.mubr.f32.vlgmr.msra.gmra.mxu1 %v2271_v55  ;;  %1785 = vmatprep.subr.mxu1 %v2138_v0  ;;  %v733_v55 = vld [vmem:[#allocation10 + $0x2d8] sm:$0xff] }
 0x339   :  { %1817 = vmatprep.mubr.msk.f32.mxu1 %vm2139_vm0, %v2138_v0  ;;  %1786 = vmatpush3.msra.mxu1 %v737_v2  ;;  %v816_v2 = vld [vmem:[#allocation10 + $0x330] sm:$0xff] }
 0x33a   :  { %1787 = vmatprep.subr.mxu1 %v2138_v0 }
 0x33b   :  { %1788 = vmatpush3.msra.mxu1 %v736_v3  ;;  %v904_v3 = vld [vmem:[#allocation10 + $0x3b0] sm:$0xff] }
 0x33c   :  { %1789 = vmatprep.subr.mxu1 %v2138_v0 }
 0x33d   :  { %1790 = vmatpush3.msra.mxu1 %v735_v4  ;;  %v815_v4 = vld [vmem:[#allocation10 + $0x328] sm:$0xff] }
 0x33e   :  { %1791 = vmatprep.subr.mxu1 %v2138_v0 }
 0x33f   :  { %1792 = vmatpush3.msra.mxu1 %v734_v5  ;;  %v903_v5 = vld [vmem:[#allocation10 + $0x3a8] sm:$0xff] }
 0x340   :  { %1793 = vmatprep.subr.mxu1 %v2138_v0 }
 0x341   :  { %1794 = vmatpush3.msra.mxu1 %v733_v55  ;;  %v814_v55 = vld [vmem:[#allocation10 + $0x320] sm:$0xff] }
 0x342   :  { %1795 = vmatprep.subr.mxu1 %v2138_v0 }
 0x343   :  { %1796 = vmatpush3.msra.mxu1 %v732_v6  ;;  %v902_v6 = vld [vmem:[#allocation10 + $0x3a0] sm:$0xff] }
 0x344   :  { %1797 = vmatprep.subr.mxu1 %v2138_v0 }
 0x345   :  { %1798 = vmatpush3.msra.mxu1 %v731_v7  ;;  %v813_v7 = vld [vmem:[#allocation10 + $0x318] sm:$0xff] }
 0x346   :  { %1799 = vmatprep.subr.mxu1 %v2138_v0 }
 0x347   :  { %1800 = vmatpush3.msra.mxu1 %v730_v8  ;;  %v901_v8 = vld [vmem:[#allocation10 + $0x398] sm:$0xff] }
 0x348   :  { %1801 = vmatprep.subr.mxu1 %v2138_v0 }
 0x349   :  { %1802 = vmatpush3.msra.mxu1 %v729_v9  ;;  %v812_v9 = vld [vmem:[#allocation10 + $0x310] sm:$0xff] }
 0x34a   :  { %1803 = vmatprep.subr.mxu1 %v2138_v0 }
 0x34b   :  { %1804 = vmatpush3.msra.mxu1 %v728_v10  ;;  %v900_v10 = vld [vmem:[#allocation10 + $0x390] sm:$0xff] }
 0x34c   :  { %1805 = vmatprep.subr.mxu1 %v2138_v0 }
 0x34d   :  { %1806 = vmatpush3.msra.mxu1 %v727_v11  ;;  %v811_v11 = vld [vmem:[#allocation10 + $0x308] sm:$0xff] }
 0x34e   :  { %1807 = vmatprep.subr.mxu1 %v2138_v0 }
 0x34f   :  { %1808 = vmatpush3.msra.mxu1 %v726_v12  ;;  %v899_v12 = vld [vmem:[#allocation10 + $0x388] sm:$0xff] }
 0x350   :  { %1809 = vmatprep.subr.mxu1 %v2138_v0 }
 0x351   :  { %1810 = vmatpush3.msra.mxu1 %v725_v13  ;;  %v810_v13 = vld [vmem:[#allocation10 + $0x300] sm:$0xff] }
 0x352   :  { %1811 = vmatprep.subr.mxu1 %v2138_v0 }
 0x353   :  { %1812 = vmatpush3.msra.mxu1 %v724_v33  ;;  %v992_v33 = vld [vmem:[#allocation10 + $0x430] sm:$0xff] }
 0x354   :  { %1813 = vmatprep.subr.mxu1 %v2138_v0 }
 0x355   :  { %1814 = vmatpush3.msra.mxu1 %v723_v35  ;;  %v991_v35 = vld [vmem:[#allocation10 + $0x428] sm:$0xff] }
 0x356   :  { %1815 = vmatprep.subr.mxu1 %v2138_v0 }
 0x357   :  { %1816 = vmatpush3.msra.mxu1 %v722_v37  ;;  %v990_v37 = vld [vmem:[#allocation10 + $0x420] sm:$0xff] }
 0x358   :  { %1855 = vmatprep.subr.mxu1 %v2138_v0 }
 0x3d8   :  { %v452_v15 = vpop.f32.mrf.mxu1 }
 0x3d9   :  { %1713 = vmatmul.mubr.f32.vlgmr.msra.gmra.mxu0 %v452_v15  ;;  %v1001_v15 = vld [vmem:[#allocation10 + $0x478] sm:$0xff] }
 0x3da   :  { %v1679_v17 = vpop.f32.mrf.mxu1  ;;  %1751 = vmatpush3.msra.mxu0 %v649_v14  ;;  %1782 = vmatprep.mubr.msk.f32.mxu0 %vm2139_vm0, %v2138_v0  ;;  %v898_v14 = vld [vmem:[#allocation10 + $0x380] sm:$0xff] }
 0x3db   :  { %1752 = vmatprep.subr.mxu0 %v2138_v0  ;;  %v1000_v17 = vld [vmem:[#allocation10 + $0x470] sm:$0xff] }
 0x3dc   :  { %1753 = vmatpush3.msra.mxu0 %v648_v16  ;;  %v1089_v16 = vld [vmem:[#allocation10 + $0x4f8] sm:$0xff] }
 0x3dd   :  { %1754 = vmatprep.subr.mxu0 %v2138_v0 }
 0x3de   :  { %1755 = vmatpush3.msra.mxu0 %v647_v18  ;;  %v1088_v18 = vld [vmem:[#allocation10 + $0x4f0] sm:$0xff] }
 0x3df   :  { %1756 = vmatprep.subr.mxu0 %v2138_v0 }
 0x3e0   :  { %1757 = vmatpush3.msra.mxu0 %v646_v19  ;;  %v999_v19 = vld [vmem:[#allocation10 + $0x468] sm:$0xff] }
 0x3e1   :  { %1758 = vmatprep.subr.mxu0 %v2138_v0 }
 0x3e2   :  { %1759 = vmatpush3.msra.mxu0 %v645_v20  ;;  %v1087_v20 = vld [vmem:[#allocation10 + $0x4e8] sm:$0xff] }
 0x3e3   :  { %1760 = vmatprep.subr.mxu0 %v2138_v0 }
 0x3e4   :  { %1761 = vmatpush3.msra.mxu0 %v644_v21  ;;  %v1086_v21 = vld [vmem:[#allocation10 + $0x4e0] sm:$0xff] }
 0x3e5   :  { %1762 = vmatprep.subr.mxu0 %v2138_v0 }
 0x3e6   :  { %1763 = vmatpush3.msra.mxu0 %v643_v22  ;;  %v997_v22 = vld [vmem:[#allocation10 + $0x458] sm:$0xff] }
 0x3e7   :  { %1764 = vmatprep.subr.mxu0 %v2138_v0 }
 0x3e8   :  { %1765 = vmatpush3.msra.mxu0 %v642_v23  ;;  %v1085_v23 = vld [vmem:[#allocation10 + $0x4d8] sm:$0xff] }
 0x3e9   :  { %1766 = vmatprep.subr.mxu0 %v2138_v0 }
 0x3ea   :  { %1767 = vmatpush3.msra.mxu0 %v641_v24  ;;  %v996_v24 = vld [vmem:[#allocation10 + $0x450] sm:$0xff] }
 0x3eb   :  { %1768 = vmatprep.subr.mxu0 %v2138_v0 }
 0x3ec   :  { %1769 = vmatpush3.msra.mxu0 %v640_v25  ;;  %v1084_v25 = vld [vmem:[#allocation10 + $0x4d0] sm:$0xff] }
 0x3ed   :  { %1770 = vmatprep.subr.mxu0 %v2138_v0 }
 0x3ee   :  { %1771 = vmatpush3.msra.mxu0 %v639_v26  ;;  %v995_v26 = vld [vmem:[#allocation10 + $0x448] sm:$0xff] }
 0x3ef   :  { %1772 = vmatprep.subr.mxu0 %v2138_v0 }
 0x3f0   :  { %1773 = vmatpush3.msra.mxu0 %v638_v27  ;;  %v1083_v27 = vld [vmem:[#allocation10 + $0x4c8] sm:$0xff] }
 0x3f1   :  { %1774 = vmatprep.subr.mxu0 %v2138_v0 }
 0x3f2   :  { %1775 = vmatpush3.msra.mxu0 %v637_v29  ;;  %v994_v29 = vld [vmem:[#allocation10 + $0x440] sm:$0xff] }
 0x3f3   :  { %1776 = vmatprep.subr.mxu0 %v2138_v0 }
 0x3f4   :  { %1777 = vmatpush3.msra.mxu0 %v636_v32  ;;  %v1081_v32 = vld [vmem:[#allocation10 + $0x4b8] sm:$0xff] }
 0x3f5   :  { %1778 = vmatprep.subr.mxu0 %v2138_v0 }
 0x3f6   :  { %1779 = vmatpush3.msra.mxu0 %v635_v34  ;;  %v1080_v34 = vld [vmem:[#allocation10 + $0x4b0] sm:$0xff] }
 0x3f7   :  { %1780 = vmatprep.subr.mxu0 %v2138_v0 }
 0x3f8   :  { %v626_v30 = vpop.f32.mrf.mxu1  ;;  %1781 = vmatpush3.msra.mxu0 %v634_v36  ;;  %v1079_v36 = vld [vmem:[#allocation10 + $0x4a8] sm:$0xff] }
 0x3f9   :  { %1820 = vmatprep.subr.mxu0 %v2138_v0 }
 0x3fa   :  { %v1749_v31 = vpop.f32.mrf.mxu1 }
 0x3fb   :  { %v993_v31 = vld [vmem:[#allocation10 + $0x438] sm:$0xff] }
 0x499   :  { %v556_v38 = vpop.f32.mrf.mxu0 }
 0x49a   :  { %v627_v40 = vadd.f32 %v626_v30, %v556_v38  ;;  %v1082_v30 = vld [vmem:[#allocation10 + $0x4c0] sm:$0xff] }
 0x49b   :  { %v1714_v42 = vpop.f32.mrf.mxu0  ;;  %v1078_v38 = vld [vmem:[#allocation10 + $0x4a0] sm:$0xff] }
 0x49c   :  { %v631_v43 = vadd.f32 %v630_v39, %v627_v40  ;;  %v989_v39 = vld [vmem:[#allocation10 + $0x418] sm:$0xff]  ;;  %v988_v42 = vld [vmem:[#allocation10 + $0x410] sm:$0xff] }
 0x49d   :  { %v1077_v40 = vld [vmem:[#allocation10 + $0x498] sm:$0xff] }
 0x49e   :  { %v2373_v44 = vmax.f32 %v631_v43, 0.0  ;;  %v1076_v43 = vld [vmem:[#allocation10 + $0x490] sm:$0xff] }
 0x4a0   :  { %1783 = vmatmul.mubr.f32.vlgmr.msra.gmra.mxu0 %v2373_v44  ;;  %1818 = vmatmul.mubr.f32.vlgmr.msra.gmra.mxu1 %v2373_v44 }
 0x4a1   :  { %1821 = vmatpush3.msra.mxu0 %v825_v45  ;;  %1856 = vmatpush3.msra.mxu1 %v913_v47  ;;  %v1075_v45 = vld [vmem:[#allocation10 + $0x488] sm:$0xff]  ;;  %v986_v47 = vld [vmem:[#allocation10 + $0x400] sm:$0xff] }
 0x4a2   :  { %1822 = vmatprep.subr.mxu0 %v2138_v0  ;;  %1857 = vmatprep.subr.mxu1 %v2138_v0 }
 0x4a3   :  { %1823 = vmatpush3.msra.mxu0 %v824_v48  ;;  %1858 = vmatpush3.msra.mxu1 %v912_v49  ;;  %v1074_v48 = vld [vmem:[#allocation10 + $0x480] sm:$0xff]  ;;  %v2447_v49 = vld [vmem:[#allocation2] sm:$0x1] }
 0x4a4   :  { %1824 = vmatprep.subr.mxu0 %v2138_v0  ;;  %1859 = vmatprep.subr.mxu1 %v2138_v0 }
 0x4a5   :  { %1825 = vmatpush3.msra.mxu0 %v823_v50  ;;  %1860 = vmatpush3.msra.mxu1 %v911_v51  ;;  %v1199_v50 = vld [vmem:[#allocation10 + $0x578] sm:$0xff]  ;;  %v1198_v51 = vld [vmem:[#allocation10 + $0x570] sm:$0xff] }
 0x4a6   :  { %1826 = vmatprep.subr.mxu0 %v2138_v0  ;;  %1861 = vmatprep.subr.mxu1 %v2138_v0 }
 0x4a7   :  { %1827 = vmatpush3.msra.mxu0 %v822_v52  ;;  %1862 = vmatpush3.msra.mxu1 %v910_v53  ;;  %v1197_v52 = vld [vmem:[#allocation10 + $0x568] sm:$0xff]  ;;  %v1196_v53 = vld [vmem:[#allocation10 + $0x560] sm:$0xff] }
 0x4a8   :  { %1828 = vmatprep.subr.mxu0 %v2138_v0  ;;  %1863 = vmatprep.subr.mxu1 %v2138_v0 }
 0x4a9   :  { %1829 = vmatpush3.msra.mxu0 %v821_v54  ;;  %1864 = vmatpush3.msra.mxu1 %v909_v56  ;;  %v1195_v54 = vld [vmem:[#allocation10 + $0x558] sm:$0xff]  ;;  %v1194_v56 = vld [vmem:[#allocation10 + $0x550] sm:$0xff] }
 0x4aa   :  { %1830 = vmatprep.subr.mxu0 %v2138_v0  ;;  %1865 = vmatprep.subr.mxu1 %v2138_v0 }
 0x4ab   :  { %1831 = vmatpush3.msra.mxu0 %v820_v57  ;;  %1866 = vmatpush3.msra.mxu1 %v908_v58  ;;  %v1193_v57 = vld [vmem:[#allocation10 + $0x548] sm:$0xff]  ;;  %v1192_v58 = vld [vmem:[#allocation10 + $0x540] sm:$0xff] }
 0x4ac   :  { %1832 = vmatprep.subr.mxu0 %v2138_v0  ;;  %1867 = vmatprep.subr.mxu1 %v2138_v0 }
 0x4ad   :  { %1833 = vmatpush3.msra.mxu0 %v819_v59  ;;  %1868 = vmatpush3.msra.mxu1 %v907_v60  ;;  %v1191_v59 = vld [vmem:[#allocation10 + $0x538] sm:$0xff]  ;;  %v1190_v60 = vld [vmem:[#allocation10 + $0x530] sm:$0xff] }
 0x4ae   :  { %1834 = vmatprep.subr.mxu0 %v2138_v0  ;;  %1869 = vmatprep.subr.mxu1 %v2138_v0 }
 0x4af   :  { %1835 = vmatpush3.msra.mxu0 %v818_v61  ;;  %1870 = vmatpush3.msra.mxu1 %v906_v62  ;;  %v1189_v61 = vld [vmem:[#allocation10 + $0x528] sm:$0xff]  ;;  %v1188_v62 = vld [vmem:[#allocation10 + $0x520] sm:$0xff] }
 0x4b0   :  { %1836 = vmatprep.subr.mxu0 %v2138_v0  ;;  %1871 = vmatprep.subr.mxu1 %v2138_v0 }
 0x4b1   :  { %1837 = vmatpush3.msra.mxu0 %v817_v63  ;;  %1872 = vmatpush3.msra.mxu1 %v905_v1  ;;  %v1187_v63 = vld [vmem:[#allocation10 + $0x518] sm:$0xff]  ;;  %v1186_v1 = vld [vmem:[#allocation10 + $0x510] sm:$0xff] }
 0x4b2   :  { %1838 = vmatprep.subr.mxu0 %v2138_v0  ;;  %1873 = vmatprep.subr.mxu1 %v2138_v0 }
 0x4b3   :  { %1839 = vmatpush3.msra.mxu0 %v816_v2  ;;  %1874 = vmatpush3.msra.mxu1 %v904_v3  ;;  %v1185_v2 = vld [vmem:[#allocation10 + $0x508] sm:$0xff]  ;;  %v1184_v3 = vld [vmem:[#allocation10 + $0x500] sm:$0xff] }
 0x4b4   :  { %1840 = vmatprep.subr.mxu0 %v2138_v0  ;;  %1875 = vmatprep.subr.mxu1 %v2138_v0 }
 0x4b5   :  { %1841 = vmatpush3.msra.mxu0 %v815_v4  ;;  %1876 = vmatpush3.msra.mxu1 %v903_v5 }
 0x4b6   :  { %1842 = vmatprep.subr.mxu0 %v2138_v0  ;;  %1877 = vmatprep.subr.mxu1 %v2138_v0 }
 0x4b7   :  { %1843 = vmatpush3.msra.mxu0 %v814_v55  ;;  %1878 = vmatpush3.msra.mxu1 %v902_v6 }
 0x4b8   :  { %1844 = vmatprep.subr.mxu0 %v2138_v0  ;;  %1879 = vmatprep.subr.mxu1 %v2138_v0 }
 0x4b9   :  { %1845 = vmatpush3.msra.mxu0 %v813_v7  ;;  %1880 = vmatpush3.msra.mxu1 %v901_v8  ;;  %v914_v7 = vld [vmem:[#allocation11 + $0x5] sm:$0x1] }
 0x4ba   :  { %1846 = vmatprep.subr.mxu0 %v2138_v0  ;;  %1881 = vmatprep.subr.mxu1 %v2138_v0 }
 0x4bb   :  { %1847 = vmatpush3.msra.mxu0 %v812_v9  ;;  %1882 = vmatpush3.msra.mxu1 %v900_v10  ;;  %v650_v10 = vld [vmem:[#allocation11 + $0x2] sm:$0x1] }
 0x4bc   :  { %1848 = vmatprep.subr.mxu0 %v2138_v0  ;;  %1883 = vmatprep.subr.mxu1 %v2138_v0 }
 0x4bd   :  { %1849 = vmatpush3.msra.mxu0 %v811_v11  ;;  %1884 = vmatpush3.msra.mxu1 %v899_v12 }
 0x4be   :  { %1850 = vmatprep.subr.mxu0 %v2138_v0  ;;  %1885 = vmatprep.subr.mxu1 %v2138_v0 }
 0x4bf   :  { %1851 = vmatpush3.msra.mxu0 %v810_v13  ;;  %1852 = vmatprep.mubr.msk.f32.mxu0 %vm2139_vm0, %v2138_v0 }
 0x4c0   :  { %1886 = vmatpush3.msra.mxu1 %v898_v14  ;;  %1887 = vmatprep.mubr.msk.f32.mxu1 %vm2139_vm0, %v2138_v0 }
 0x4c1   :  { %1853 = vmatmul.mubr.f32.vlgmr.msra.gmra.mxu0 %v2373_v44  ;;  %1888 = vmatmul.mubr.f32.vlgmr.msra.gmra.mxu1 %v2247_v41  ;;  %v998_v41 = vld [vmem:[#allocation10 + $0x460] sm:$0xff]  ;;  %v987_v44 = vld [vmem:[#allocation10 + $0x408] sm:$0xff] }
 0x4c2   :  { %1890 = vmatprep.subr.mxu0 %v2138_v0  ;;  %1925 = vmatprep.subr.mxu1 %v2138_v0 }
 0x4c3   :  { %1891 = vmatpush3.msra.mxu0 %v1001_v15  ;;  %1926 = vmatpush3.msra.mxu1 %v1089_v16 }
 0x4c4   :  { %1892 = vmatprep.subr.mxu0 %v2138_v0  ;;  %1927 = vmatprep.subr.mxu1 %v2138_v0 }
 0x4c5   :  { %1893 = vmatpush3.msra.mxu0 %v1000_v17  ;;  %1928 = vmatpush3.msra.mxu1 %v1088_v18 }
 0x4c6   :  { %1894 = vmatprep.subr.mxu0 %v2138_v0  ;;  %1929 = vmatprep.subr.mxu1 %v2138_v0 }
 0x4c7   :  { %1895 = vmatpush3.msra.mxu0 %v999_v19  ;;  %1930 = vmatpush3.msra.mxu1 %v1087_v20  ;;  %v738_v19 = vld [vmem:[#allocation11 + $0x3] sm:$0x1] }
 0x4c8   :  { %1896 = vmatprep.subr.mxu0 %v2138_v0  ;;  %1931 = vmatprep.subr.mxu1 %v2138_v0 }
 0x4c9   :  { %1897 = vmatpush3.msra.mxu0 %v998_v41  ;;  %1932 = vmatpush3.msra.mxu1 %v1086_v21 }
 0x4ca   :  { %1898 = vmatprep.subr.mxu0 %v2138_v0  ;;  %1933 = vmatprep.subr.mxu1 %v2138_v0 }
 0x4cb   :  { %1899 = vmatpush3.msra.mxu0 %v997_v22  ;;  %1934 = vmatpush3.msra.mxu1 %v1085_v23 }
 0x4cc   :  { %1900 = vmatprep.subr.mxu0 %v2138_v0  ;;  %1935 = vmatprep.subr.mxu1 %v2138_v0 }
 0x4cd   :  { %1901 = vmatpush3.msra.mxu0 %v996_v24  ;;  %1936 = vmatpush3.msra.mxu1 %v1084_v25 }
 0x4ce   :  { %1902 = vmatprep.subr.mxu0 %v2138_v0  ;;  %1937 = vmatprep.subr.mxu1 %v2138_v0 }
 0x4cf   :  { %1903 = vmatpush3.msra.mxu0 %v995_v26  ;;  %1938 = vmatpush3.msra.mxu1 %v1083_v27  ;;  %v1090_v27 = vld [vmem:[#allocation11 + $0x7] sm:$0x1] }
 0x4d0   :  { %1904 = vmatprep.subr.mxu0 %v2138_v0  ;;  %1939 = vmatprep.subr.mxu1 %v2138_v0 }
 0x4d1   :  { %1905 = vmatpush3.msra.mxu0 %v994_v29  ;;  %1940 = vmatpush3.msra.mxu1 %v1082_v30 }
 0x4d2   :  { %1906 = vmatprep.subr.mxu0 %v2138_v0  ;;  %1941 = vmatprep.subr.mxu1 %v2138_v0 }
 0x4d3   :  { %1907 = vmatpush3.msra.mxu0 %v993_v31  ;;  %1942 = vmatpush3.msra.mxu1 %v1081_v32  ;;  %v826_v31 = vld [vmem:[#allocation11 + $0x4] sm:$0x1] }
 0x4d4   :  { %1908 = vmatprep.subr.mxu0 %v2138_v0  ;;  %1943 = vmatprep.subr.mxu1 %v2138_v0 }
 0x4d5   :  { %1909 = vmatpush3.msra.mxu0 %v992_v33  ;;  %1944 = vmatpush3.msra.mxu1 %v1080_v34 }
 0x4d6   :  { %1910 = vmatprep.subr.mxu0 %v2138_v0  ;;  %1945 = vmatprep.subr.mxu1 %v2138_v0 }
 0x4d7   :  { %1911 = vmatpush3.msra.mxu0 %v991_v35  ;;  %1946 = vmatpush3.msra.mxu1 %v1079_v36 }
 0x4d8   :  { %1912 = vmatprep.subr.mxu0 %v2138_v0  ;;  %1947 = vmatprep.subr.mxu1 %v2138_v0 }
 0x4d9   :  { %1913 = vmatpush3.msra.mxu0 %v990_v37  ;;  %1948 = vmatpush3.msra.mxu1 %v1078_v38 }
 0x4da   :  { %1914 = vmatprep.subr.mxu0 %v2138_v0  ;;  %1949 = vmatprep.subr.mxu1 %v2138_v0 }
 0x4db   :  { %1915 = vmatpush3.msra.mxu0 %v989_v39  ;;  %1950 = vmatpush3.msra.mxu1 %v1077_v40 }
 0x4dc   :  { %1916 = vmatprep.subr.mxu0 %v2138_v0  ;;  %1951 = vmatprep.subr.mxu1 %v2138_v0 }
 0x4dd   :  { %1917 = vmatpush3.msra.mxu0 %v988_v42  ;;  %1952 = vmatpush3.msra.mxu1 %v1076_v43 }
 0x4de   :  { %1918 = vmatprep.subr.mxu0 %v2138_v0  ;;  %1953 = vmatprep.subr.mxu1 %v2138_v0 }
 0x4df   :  { %1919 = vmatpush3.msra.mxu0 %v987_v44  ;;  %1922 = vmatprep.mubr.msk.f32.mxu0 %vm2139_vm0, %v2138_v0  ;;  %v1200_v44 = vld [vmem:[#allocation11 + $0x8] sm:$0x1] }
 0x4e0   :  { %1920 = vmatprep.subr.mxu0 %v2138_v0  ;;  %1954 = vmatpush3.msra.mxu1 %v1075_v45 }
 0x4e1   :  { %1921 = vmatpush3.msra.mxu0 %v986_v47  ;;  %1955 = vmatprep.subr.mxu1 %v2138_v0 }
 0x4e2   :  { %1923 = vmatmul.mubr.f32.vlgmr.msra.gmra.mxu0 %v2447_v49  ;;  %1956 = vmatpush3.msra.mxu1 %v1074_v48 }
 0x4e3   :  { %1957 = vmatprep.mubr.msk.f32.mxu1 %vm2139_vm0, %v2138_v0  ;;  %1960 = vmatprep.subr.mxu0 %v2138_v0 }
 0x4e4   :  { %1958 = vmatmul.mubr.f32.vlgmr.msra.gmra.mxu1 %v2447_v49  ;;  %1992 = vmatprep.mubr.msk.f32.mxu0 %vm2139_vm0, %v2138_v0 }
 0x4e5   :  { %1961 = vmatpush3.msra.mxu0 %v1199_v50 }
 0x4e6   :  { %1962 = vmatprep.subr.mxu0 %v2138_v0 }
 0x4e7   :  { %1963 = vmatpush3.msra.mxu0 %v1198_v51 }
 0x4e8   :  { %1964 = vmatprep.subr.mxu0 %v2138_v0 }
 0x4e9   :  { %1965 = vmatpush3.msra.mxu0 %v1197_v52 }
 0x4ea   :  { %1966 = vmatprep.subr.mxu0 %v2138_v0 }
 0x4eb   :  { %1967 = vmatpush3.msra.mxu0 %v1196_v53 }
 0x4ec   :  { %1968 = vmatprep.subr.mxu0 %v2138_v0 }
 0x4ed   :  { %1969 = vmatpush3.msra.mxu0 %v1195_v54 }
 0x4ee   :  { %1970 = vmatprep.subr.mxu0 %v2138_v0 }
 0x4ef   :  { %1971 = vmatpush3.msra.mxu0 %v1194_v56 }
 0x4f0   :  { %1972 = vmatprep.subr.mxu0 %v2138_v0 }
 0x4f1   :  { %1973 = vmatpush3.msra.mxu0 %v1193_v57 }
 0x4f2   :  { %1974 = vmatprep.subr.mxu0 %v2138_v0 }
 0x4f3   :  { %1975 = vmatpush3.msra.mxu0 %v1192_v58 }
 0x4f4   :  { %1976 = vmatprep.subr.mxu0 %v2138_v0 }
 0x4f5   :  { %1977 = vmatpush3.msra.mxu0 %v1191_v59 }
 0x4f6   :  { %1978 = vmatprep.subr.mxu0 %v2138_v0 }
 0x4f7   :  { %1979 = vmatpush3.msra.mxu0 %v1190_v60 }
 0x4f8   :  { %1980 = vmatprep.subr.mxu0 %v2138_v0 }
 0x4f9   :  { %1981 = vmatpush3.msra.mxu0 %v1189_v61 }
 0x4fa   :  { %1982 = vmatprep.subr.mxu0 %v2138_v0 }
 0x4fb   :  { %1983 = vmatpush3.msra.mxu0 %v1188_v62  ;;  %v1290_v62 = vrot.slane %v2314_v46, 6 }
 0x4fc   :  { %1984 = vmatprep.subr.mxu0 %v2138_v0 }
 0x4fd   :  { %1985 = vmatpush3.msra.mxu0 %v1187_v63 }
 0x4fe   :  { %1986 = vmatprep.subr.mxu0 %v2138_v0 }
 0x4ff   :  { %1987 = vmatpush3.msra.mxu0 %v1186_v1 }
 0x500   :  { %1988 = vmatprep.subr.mxu0 %v2138_v0 }
 0x501   :  { %1989 = vmatpush3.msra.mxu0 %v1185_v2 }
 0x502   :  { %1990 = vmatprep.subr.mxu0 %v2138_v0  ;;  %v1002_v0 = vld [vmem:[#allocation11 + $0x6] sm:$0x1] }
 0x503   :  { %1991 = vmatpush3.msra.mxu0 %v1184_v3 }
 0x560   :  { %v717_v4 = vpop.f32.mrf.mxu0  ;;  %v805_v5 = vpop.f32.mrf.mxu1 }
 0x561   :  { %v718_v14 = vadd.f32 %v717_v4, %v650_v10  ;;  %v806_v41 = vadd.f32 %v805_v5, %v738_v19 }
 0x562   :  { %v1784_v55 = vpop.f32.mrf.mxu0  ;;  %v1819_v6 = vpop.f32.mrf.mxu1 }
 0x581   :  { %v893_v8 = vpop.f32.mrf.mxu0  ;;  %v981_v9 = vpop.f32.mrf.mxu1 }
 0x582   :  { %v982_v11 = vadd.f32 %v981_v9, %v914_v7  ;;  %v894_v33 = vadd.f32 %v893_v8, %v826_v31 }
 0x583   :  { %v1854_v12 = vpop.f32.mrf.mxu0  ;;  %v1889_v13 = vpop.f32.mrf.mxu1 }
 0x584   :  { %v1161_v15 = vadd.f32 %v982_v11, %v718_v14 }
 0x586   :  { %v1317_v16 = vmul.f32 -1.442695, %v1161_v15 }
 0x588   :  { %2009 = vpow2.f32 %v1317_v16 }
 0x595   :  { %v2010_v17 = vpop.eup %2009 }
 0x596   :  { %v1165_v18 = vadd.f32 1.0, %v2010_v17 }
 0x598   :  { %2011 = vrcp.f32 %v1165_v18 }
 0x5a2   :  { %v1069_v20 = vpop.f32.mrf.mxu0 }
 0x5a3   :  { %v1070_v21 = vadd.f32 %v1069_v20, %v1002_v0 }
 0x5a4   :  { %v1924_v22 = vpop.f32.mrf.mxu0  ;;  %v1157_v23 = vpop.f32.mrf.mxu1 }
 0x5a5   :  { %v1168_v24 = vadd.f32 %v1070_v21, %v806_v41  ;;  %v1158_v29 = vadd.f32 %v1157_v23, %v1090_v27  ;;  %v2012_v30 = vpop.eup %2011 }
 0x5a6   :  { %v1959_v25 = vpop.f32.mrf.mxu1 }
 0x5a7   :  { %v1318_v26 = vmul.f32 -1.442695, %v1168_v24  ;;  %v1175_v32 = vmul.f32 %v2012_v30, %v1158_v29 }
 0x5a9   :  { %2013 = vpow2.f32 %v1318_v26  ;;  %v1176_v36 = vadd.f32 %v1175_v32, %v894_v33 }
 0x5b6   :  { %v2014_v34 = vpop.eup %2013 }
 0x5b7   :  { %v1172_v35 = vadd.f32 1.0, %v2014_v34 }
 0x5b9   :  { %2015 = vrcp.f32 %v1172_v35 }
 0x5ba   :  { %2017 = vtanh.f32 %v1176_v36 }
 0x5c6   :  { %v2016_v37 = vpop.eup %2015 }
 0x5c7   :  { %v1178_v38 = vsub.f32 1.0, %v2016_v37  ;;  %v2018_v39 = vpop.eup %2017  ;;  %v1180_v42 = vmul.f32 %v2447_v49, %v2016_v37 }
 0x5c9   :  { %v1179_v40 = vmul.f32 %v2018_v39, %v1178_v38 }
 0x5cb   :  { %v1181_v43 = vadd.f32 %v1180_v42, %v1179_v40 }
 0x5cd   :  { %1182 = vst [vmem:[#allocation2] sm:$0x1] %v1181_v43  ;;  %1993 = vmatmul.mubr.f32.vlgmr.msra.gmra.mxu0 %v1181_v43  ;;  %v1287_v61 = vrot.slane %v1181_v43, 7 }
 0x68d   :  { %v1267_v45 = vpop.f32.mrf.mxu0 }
 0x68e   :  { %v1268_v47 = vadd.f32 %v1267_v45, %v1200_v44 }
 0x68f   :  { %v1994_v48 = vpop.f32.mrf.mxu0 }
 0x690   :  { %v1272_v50 = vsel %vm1271_vm4, %v1268_v47, -1e+30 }
 0x691   :  { %v1273_v51 = vsel %vm355_vm3, %v1272_v50, -inf }
 0x692   :  { %1274 = vmax.xlane.f32.xlu1 %v1273_v51 }
 0x71b   :  { %v1275_v52 = vpop.xlane.xlu1 %1274 }
 0x71c   :  { %v1276_v53 = vsub.f32 %v1272_v50, %v1275_v52 }
 0x71e   :  { %v1277_v54 = vmul.f32 1.442695, %v1276_v53 }
 0x720   :  { %2019 = vpow2.f32 %v1277_v54 }
 0x72d   :  { %v2020_v56 = vpop.eup %2019 }
 0x72e   :  { %v1279_v49 = vsel %vm355_vm3, %v2020_v56, 0.0 }
 0x72f   :  { %1280 = vadd.xlane.f32.xlu1 %v1279_v49 }
 0x7b8   :  { %v1281_v57 = vpop.xlane.xlu1 %1280 }
 0x7b9   :  { %2021 = vlog2.f32 %v1281_v57 }
 0x7c6   :  { %v2022_v58 = vpop.eup %2021 }
 0x7c7   :  { %v1283_v59 = vmul.f32 0.6931472, %v2022_v58 }
 0x7c9   :  { %v1284_v60 = vadd.f32 %v1283_v59, %v1275_v52 }
 0x7cb   :  { %v1285_v28 = vsub.f32 %v1272_v50, %v1284_v60 }
 0x7cd   :  { %v1292_v63 = vsel %vm355_vm3, %v1285_v28, %v1287_v61 }
 0x7ce   :  { %v1294_v1 = vsel %vm1293_vm5, %v1292_v63, %v1290_v62 }
 0x7cf   :  { %v1296_v2 = vsel %vm1295_vm6, %v1294_v1, 0.0 }
 0x7d0   :  { %1297 = vst [vmem:[#allocation13] sm:$0xff] %v1296_v2 }
 0x7d1   :  { %2115 = shalt.err (!%p2112_p10)
}
 0x7d2   :  { %1307 = dma.vmem_to_hbm [thread:$0]  %s1305_s18, 128, %s2486_s6, [#allocation7]  }
 0x7d3   :  { %2130 = dma.done.wait [#allocation7], 128  }
 0x7d4   :  { %2131 = vsyncadd [#allocation7], 4294967168 }
 0x7d5   :  { %1311 = vsyncpa [#allocation6], 1 }
 0x7d6   :  { %1312 = vsyncpa [#allocation9], 1 }
 0x7d7   :  { %1313 = vsyncpa [#allocation12], 1 }
 0x7d8   :  { %1314 = vsyncpa [#allocation7], 1 }

</bundles_post_ra>
